<compile_context>
chip_gen: v6e
topology: v6e:2x2x1
jax: 0.10.0
libtpu: 0.0.40
codegen_flags: <defaults>
</compile_context>

<pallas_src>
import jax
import jax.numpy as jnp
from jax.experimental import pallas as pl
from jax.experimental.pallas import tpu as pltpu


def _discriminator_kernel(img_ref, age_ref,
                          w1i_ref, w1a_ref, b1_ref,
                          w2_ref, b2_ref,
                          w3_ref, b3_ref,
                          o_ref, acc_ref):
    k = pl.program_id(1)

    @pl.when(k == 0)
    def _():
        acc_ref[...] = jnp.zeros_like(acc_ref)

    # ---- Layer 1 partial product for this K slice (bf16 MXU, f32 acc) ----
    acc_ref[...] += jnp.dot(img_ref[...].astype(jnp.bfloat16), w1i_ref[...],
                            preferred_element_type=jnp.float32)

    @pl.when(k == pl.num_programs(1) - 1)
    def _():
        age = age_ref[...].astype(jnp.float32)
        h1 = acc_ref[...]
        if w1a_ref.shape[0] == 1:
            # age_dim == 1: rank-1 broadcast on the VPU, not a ragged K=1 matmul.
            h1 = h1 + age * w1a_ref[...].astype(jnp.float32)
        else:
            h1 = h1 + jnp.dot(age.astype(jnp.bfloat16), w1a_ref[...],
                              preferred_element_type=jnp.float32)
        h1 = h1 + b1_ref[...]
        h1 = jnp.maximum(h1, 0.2 * h1)                     # LeakyReLU(0.2)

        # ---- Layer 2: Linear + LeakyReLU(0.2) ----
        h2 = jnp.dot(h1.astype(jnp.bfloat16), w2_ref[...],
                     preferred_element_type=jnp.float32) + b2_ref[...]
        h2 = jnp.maximum(h2, 0.2 * h2)                     # LeakyReLU(0.2)

        # ---- Layer 3 (out_dim == 1): VPU multiply + lane reduction ----
        logits = jnp.sum(h2 * w3_ref[...], axis=-1, keepdims=True) + b3_ref[...]
        # Exact sigmoid: guaranteed within [0, 1].
        o_ref[...] = (1.0 / (1.0 + jnp.exp(-logits))).astype(o_ref.dtype)


def _round_up(x, m):
    return ((x + m - 1) // m) * m


def _pick_batch_tile(B):
    if B <= 16:
        return B                                   # single step; latency-bound
    if B <= 256:
        return _round_up(pl.cdiv(B, 2), 8)         # 2 parallel steps (v7x: 2 TCs)
    return 512                                     # large-B streaming tile


def _pick_k_tile(img_dim):
    if img_dim <= 4096:
        return img_dim                             # single K step
    for tk in (4096, 3072, 2048, 1536, 1024, 768, 512, 384, 256, 128):
        if img_dim % tk == 0:
            return tk
    return img_dim                                 # fall back: single K block


def discriminator_forward(img, age, params):
    """img: [B, img_dim] (f32 or bf16), age: [B, age_dim] -> [B, 1] probs."""
    w1i, w1a, b1, w2, b2, w3_row, b3 = params
    B, img_dim = img.shape
    age_dim = age.shape[1]
    h1 = w1i.shape[1]
    h2 = w2.shape[1]

    TB = _pick_batch_tile(B)
    TK = _pick_k_tile(img_dim)
    grid = (pl.cdiv(B, TB), pl.cdiv(img_dim, TK))

    const = lambda i, k: (0, 0)        # weights/biases: same block every step
    batched = lambda i, k: (i, 0)      # activations/output: stream over batch

    nbytes = lambda a: a.size * a.dtype.itemsize
    weight_bytes = sum(int(nbytes(p)) for p in params)
    cost = pl.CostEstimate(
        flops=int(2 * B * (img_dim * h1 + h1 * h2 + h2)),
        transcendentals=int(B),
        bytes_accessed=int(nbytes(img) + nbytes(age) + weight_bytes + B * 4),
    )

    return pl.pallas_call(
        _discriminator_kernel,
        out_shape=jax.ShapeDtypeStruct((B, 1), jnp.float32),
        grid=grid,
        in_specs=[
            pl.BlockSpec((TB, TK), lambda i, k: (i, k)),   # img   (B x K tiles)
            pl.BlockSpec((TB, age_dim), batched),          # age
            pl.BlockSpec((TK, h1), lambda i, k: (k, 0)),   # W1_img (bf16, K-blocked)
            pl.BlockSpec((age_dim, h1), const),            # W1_age (bf16)
            pl.BlockSpec((1, h1), const),                  # b1     (f32)
            pl.BlockSpec((h1, h2), const),                 # W2     (bf16)
            pl.BlockSpec((1, h2), const),                  # b2     (f32)
            pl.BlockSpec((1, h2), const),                  # W3 row (f32)
            pl.BlockSpec((1, 1), const),                   # b3     (f32)
        ],
        out_specs=pl.BlockSpec((TB, 1), batched),
        scratch_shapes=[pltpu.VMEM((TB, h1), jnp.float32)],   # layer-1 accumulator
        compiler_params=pltpu.CompilerParams(
            dimension_semantics=("parallel", "arbitrary"),
            vmem_limit_bytes=32 * 1024 * 1024),
        cost_estimate=cost,
    )(img, age, w1i, w1a, b1, w2, b2, w3_row, b3)


def init_params(key, img_dim, age_dim, hidden1=512, hidden2=256, out_dim=1):
    """PyTorch-style init U(-1/sqrt(fan_in), 1/sqrt(fan_in)).

    W1 is split into (img part, age part) so the kernel fuses the concat.
    W3 is stored as a [1, hidden2] row for the VPU/XLU layer-3 path.
    Matmul weights stored bf16 (f32 accumulation in-kernel), biases/W3 f32.
    """
    ks = jax.random.split(key, 6)

    def lin(kw, kb, fan_in, fan_out):
        bound = 1.0 / jnp.sqrt(jnp.float32(fan_in))
        w = jax.random.uniform(kw, (fan_in, fan_out), jnp.float32, -bound, bound)
        b = jax.random.uniform(kb, (1, fan_out), jnp.float32, -bound, bound)
        return w, b

    w1, b1 = lin(ks[0], ks[1], img_dim + age_dim, hidden1)
    w2, b2 = lin(ks[2], ks[3], hidden1, hidden2)
    w3, b3 = lin(ks[4], ks[5], hidden2, out_dim)

    w1_img = w1[:img_dim].astype(jnp.bfloat16)
    w1_age = w1[img_dim:].astype(jnp.bfloat16)
    w3_row = w3.T                                  # [out_dim, hidden2] = [1, 256]
    return (w1_img, w1_age, b1,
            w2.astype(jnp.bfloat16), b2,
            w3_row, b3)


def discriminator_reference(img, age, params):
    """Pure-JAX reference mirroring the kernel's dtype path (bf16 dots, f32 acc)."""
    w1i, w1a, b1, w2, b2, w3_row, b3 = params
    bf = jnp.bfloat16
    h = jnp.dot(img.astype(bf), w1i, preferred_element_type=jnp.float32)
    if w1a.shape[0] == 1:
        h = h + age.astype(jnp.float32) * w1a.astype(jnp.float32)
    else:
        h = h + jnp.dot(age.astype(bf), w1a, preferred_element_type=jnp.float32)
    h = h + b1
    h = jnp.maximum(h, 0.2 * h)
    h = jnp.dot(h.astype(bf), w2, preferred_element_type=jnp.float32) + b2
    h = jnp.maximum(h, 0.2 * h)
    logits = jnp.sum(h * w3_row, axis=-1, keepdims=True) + b3
    return 1.0 / (1.0 + jnp.exp(-logits))


if __name__ == "__main__":
    # Small shapes consistent with the module: img_size=16 -> img_dim=16*16*3=768
    # (the real module uses img_size=128 -> img_dim=49152, which the K-blocking
    # path handles without changing this script).
    batch = 2
    img_size = 16
    img_dim = img_size * img_size * 3   # 768 (clean multiple of 128)
    age_dim = 1

    key = jax.random.PRNGKey(0)
    k_img, k_age, k_params = jax.random.split(key, 3)

    # Producer emits bf16 directly (per perf review) — no wrapper-side cast.
    img = jax.random.normal(k_img, (batch, img_dim), dtype=jnp.bfloat16)
    age = jax.random.uniform(k_age, (batch, age_dim), dtype=jnp.float32)

    params = init_params(k_params, img_dim, age_dim)

    fwd = jax.jit(discriminator_forward)
    out = jax.block_until_ready(fwd(img, age, params))

    ref = discriminator_reference(img, age, params)

    assert out.shape == (batch, 1)
    assert bool(jnp.all((out >= 0.0) & (out <= 1.0)))
    assert bool(jnp.allclose(out, ref, atol=1e-2))
    print("KERNEL_OK")
</pallas_src>

<mosaic_0001>
module attributes {stable_mosaic.version = 11 : i64} {
  func.func @_discriminator_kernel(%arg0: i32, %arg1: i32, %arg2: memref<2x768xbf16, #tpu.memory_space<vmem>>, %arg3: memref<2x1xf32, #tpu.memory_space<vmem>>, %arg4: memref<768x512xbf16, #tpu.memory_space<vmem>>, %arg5: memref<1x512xbf16, #tpu.memory_space<vmem>>, %arg6: memref<1x512xf32, #tpu.memory_space<vmem>>, %arg7: memref<512x256xbf16, #tpu.memory_space<vmem>>, %arg8: memref<1x256xf32, #tpu.memory_space<vmem>>, %arg9: memref<1x256xf32, #tpu.memory_space<vmem>>, %arg10: memref<1x1xf32, #tpu.memory_space<vmem>>, %arg11: memref<2x1xf32, #tpu.memory_space<vmem>>, %arg12: memref<2x512xf32, #tpu.memory_space<vmem>>) attributes {dimension_semantics = [#tpu.dimension_semantics<parallel>, #tpu.dimension_semantics<arbitrary>], iteration_bounds = array<i64: 1, 1>, scalar_prefetch = 0 : i64, scratch_operands = 1 : i64, tpu.core_type = #tpu.core_type<tc>, window_params = [{transform_indices = @transform_0, window_bounds = array<i64: 2, 768>}, {transform_indices = @transform_1, window_bounds = array<i64: 2, 1>}, {transform_indices = @transform_2, window_bounds = array<i64: 768, 512>}, {pipeline_mode = #tpu.pipeline_mode<synchronous>, transform_indices = @transform_3, window_bounds = array<i64: 1, 512>}, {pipeline_mode = #tpu.pipeline_mode<synchronous>, transform_indices = @transform_4, window_bounds = array<i64: 1, 512>}, {pipeline_mode = #tpu.pipeline_mode<synchronous>, transform_indices = @transform_5, window_bounds = array<i64: 512, 256>}, {pipeline_mode = #tpu.pipeline_mode<synchronous>, transform_indices = @transform_6, window_bounds = array<i64: 1, 256>}, {pipeline_mode = #tpu.pipeline_mode<synchronous>, transform_indices = @transform_7, window_bounds = array<i64: 1, 256>}, {pipeline_mode = #tpu.pipeline_mode<synchronous>, transform_indices = @transform_8, window_bounds = array<i64: 1, 1>}, {transform_indices = @transform_9, window_bounds = array<i64: 2, 1>}]} {
    %c0_i32 = arith.constant 0 : i32
    %0 = arith.cmpi eq, %arg1, %c0_i32 : i32
    %1 = arith.extui %0 : i1 to i32
    %c0_i32_0 = arith.constant 0 : i32
    %2 = arith.cmpi ne, %1, %c0_i32_0 : i32
    scf.if %2 {
      %cst_10 = arith.constant 0.000000e+00 : f32
      %12 = vector.broadcast %cst_10 : f32 to vector<2x512xf32>
      %c0_11 = arith.constant 0 : index
      %c0_12 = arith.constant 0 : index
      %13 = vector.load %arg12[%c0_11, %c0_12] : memref<2x512xf32, #tpu.memory_space<vmem>>, vector<2x512xf32>
      tpu.vector_store %arg12[%c0_11, %c0_12], %12 {strides = array<i32>} : memref<2x512xf32, #tpu.memory_space<vmem>>, vector<2x512xf32>,
    } else {
    }
    %c0 = arith.constant 0 : index
    %c0_1 = arith.constant 0 : index
    %3 = vector.load %arg12[%c0, %c0_1] : memref<2x512xf32, #tpu.memory_space<vmem>>, vector<2x512xf32>
    %c0_2 = arith.constant 0 : index
    %c0_3 = arith.constant 0 : index
    %4 = vector.load %arg2[%c0_2, %c0_3] : memref<2x768xbf16, #tpu.memory_space<vmem>>, vector<2x768xbf16>
    %c0_4 = arith.constant 0 : index
    %c0_5 = arith.constant 0 : index
    %5 = vector.load %arg4[%c0_4, %c0_5] : memref<768x512xbf16, #tpu.memory_space<vmem>>, vector<768x512xbf16>
    %cst = arith.constant dense<0.000000e+00> : vector<2x512xf32>
    %6 = tpu.matmul %4, %5, %cst {dimension_numbers = #tpu.dot_dimension_numbers<[1], [0], [0], [1], [0, 0, 1, 1], [], []>} : vector<2x768xbf16>, vector<768x512xbf16>, vector<2x512xf32> -> vector<2x512xf32>
    %7 = arith.addf %3, %6 : vector<2x512xf32>
    %c0_6 = arith.constant 0 : index
    %c0_7 = arith.constant 0 : index
    %8 = vector.load %arg12[%c0_6, %c0_7] : memref<2x512xf32, #tpu.memory_space<vmem>>, vector<2x512xf32>
    tpu.vector_store %arg12[%c0_6, %c0_7], %7 {strides = array<i32>} : memref<2x512xf32, #tpu.memory_space<vmem>>, vector<2x512xf32>,
    %c0_i32_8 = arith.constant 0 : i32
    %9 = arith.cmpi eq, %arg1, %c0_i32_8 : i32
    %10 = arith.extui %9 : i1 to i32
    %c0_i32_9 = arith.constant 0 : i32
    %11 = arith.cmpi ne, %10, %c0_i32_9 : i32
    scf.if %11 {
      %c0_10 = arith.constant 0 : index
      %c0_11 = arith.constant 0 : index
      %12 = vector.load %arg3[%c0_10, %c0_11] : memref<2x1xf32, #tpu.memory_space<vmem>>, vector<2x1xf32>
      %c0_12 = arith.constant 0 : index
      %c0_13 = arith.constant 0 : index
      %13 = vector.load %arg12[%c0_12, %c0_13] : memref<2x512xf32, #tpu.memory_space<vmem>>, vector<2x512xf32>
      %c0_14 = arith.constant 0 : index
      %c0_15 = arith.constant 0 : index
      %14 = vector.load %arg5[%c0_14, %c0_15] : memref<1x512xbf16, #tpu.memory_space<vmem>>, vector<1x512xbf16>
      %15 = arith.extf %14 : vector<1x512xbf16> to vector<1x512xf32>
      %16 = vector.broadcast %12 : vector<2x1xf32> to vector<2x512xf32>
      %17 = vector.broadcast %15 : vector<1x512xf32> to vector<2x512xf32>
      %18 = arith.mulf %16, %17 : vector<2x512xf32>
      %19 = arith.addf %13, %18 : vector<2x512xf32>
      %c0_16 = arith.constant 0 : index
      %c0_17 = arith.constant 0 : index
      %20 = vector.load %arg6[%c0_16, %c0_17] : memref<1x512xf32, #tpu.memory_space<vmem>>, vector<1x512xf32>
      %21 = vector.broadcast %20 : vector<1x512xf32> to vector<2x512xf32>
      %22 = arith.addf %19, %21 : vector<2x512xf32>
      %cst_18 = arith.constant 2.000000e-01 : f32
      %23 = vector.broadcast %cst_18 : f32 to vector<2x512xf32>
      %24 = arith.mulf %23, %22 : vector<2x512xf32>
      %25 = arith.maximumf %22, %24 : vector<2x512xf32>
      %26 = arith.truncf %25 : vector<2x512xf32> to vector<2x512xbf16>
      %c0_19 = arith.constant 0 : index
      %c0_20 = arith.constant 0 : index
      %27 = vector.load %arg7[%c0_19, %c0_20] : memref<512x256xbf16, #tpu.memory_space<vmem>>, vector<512x256xbf16>
      %cst_21 = arith.constant dense<0.000000e+00> : vector<2x256xf32>
      %28 = tpu.matmul %26, %27, %cst_21 {dimension_numbers = #tpu.dot_dimension_numbers<[1], [0], [0], [1], [0, 0, 1, 1], [], []>} : vector<2x512xbf16>, vector<512x256xbf16>, vector<2x256xf32> -> vector<2x256xf32>
      %c0_22 = arith.constant 0 : index
      %c0_23 = arith.constant 0 : index
      %29 = vector.load %arg8[%c0_22, %c0_23] : memref<1x256xf32, #tpu.memory_space<vmem>>, vector<1x256xf32>
      %30 = vector.broadcast %29 : vector<1x256xf32> to vector<2x256xf32>
      %31 = arith.addf %28, %30 : vector<2x256xf32>
      %cst_24 = arith.constant 2.000000e-01 : f32
      %32 = vector.broadcast %cst_24 : f32 to vector<2x256xf32>
      %33 = arith.mulf %32, %31 : vector<2x256xf32>
      %34 = arith.maximumf %31, %33 : vector<2x256xf32>
      %c0_25 = arith.constant 0 : index
      %c0_26 = arith.constant 0 : index
      %35 = vector.load %arg9[%c0_25, %c0_26] : memref<1x256xf32, #tpu.memory_space<vmem>>, vector<1x256xf32>
      %36 = vector.broadcast %35 : vector<1x256xf32> to vector<2x256xf32>
      %37 = arith.mulf %34, %36 : vector<2x256xf32>
      %cst_27 = arith.constant dense<0.000000e+00> : vector<2xf32>
      %38 = vector.multi_reduction <add>, %37, %cst_27 [1] : vector<2x256xf32> to vector<2xf32>
      %39 = vector.shape_cast %38 : vector<2xf32> to vector<2x1xf32>
      %c0_28 = arith.constant 0 : index
      %c0_29 = arith.constant 0 : index
      %40 = vector.load %arg10[%c0_28, %c0_29] : memref<1x1xf32, #tpu.memory_space<vmem>>, vector<1x1xf32>
      %41 = vector.broadcast %40 : vector<1x1xf32> to vector<2x1xf32>
      %42 = arith.addf %39, %41 : vector<2x1xf32>
      %cst_30 = arith.constant 0.000000e+00 : f32
      %43 = vector.broadcast %cst_30 : f32 to vector<2x1xf32>
      %44 = arith.subf %43, %42 : vector<2x1xf32>
      %45 = math.exp %44 : vector<2x1xf32>
      %cst_31 = arith.constant 1.000000e+00 : f32
      %46 = vector.broadcast %cst_31 : f32 to vector<2x1xf32>
      %47 = arith.addf %46, %45 : vector<2x1xf32>
      %cst_32 = arith.constant 1.000000e+00 : f32
      %48 = vector.broadcast %cst_32 : f32 to vector<2x1xf32>
      %49 = arith.divf %48, %47 : vector<2x1xf32>
      %c0_33 = arith.constant 0 : index
      %c0_34 = arith.constant 0 : index
      %50 = vector.load %arg11[%c0_33, %c0_34] : memref<2x1xf32, #tpu.memory_space<vmem>>, vector<2x1xf32>
      tpu.vector_store %arg11[%c0_33, %c0_34], %49 {strides = array<i32>} : memref<2x1xf32, #tpu.memory_space<vmem>>, vector<2x1xf32>,
    } else {
    }
    return
  }
  func.func @transform_0(%arg0: i32, %arg1: i32) -> (i32, i32) {
    %c0_i32 = arith.constant 0 : i32
    return %arg0, %arg1 : i32, i32
  }
  func.func @transform_1(%arg0: i32, %arg1: i32) -> (i32, i32) {
    %c0_i32 = arith.constant 0 : i32
    %c0_i32_0 = arith.constant 0 : i32
    return %arg0, %c0_i32 : i32, i32
  }
  func.func @transform_2(%arg0: i32, %arg1: i32) -> (i32, i32) {
    %c0_i32 = arith.constant 0 : i32
    %c0_i32_0 = arith.constant 0 : i32
    return %arg1, %c0_i32 : i32, i32
  }
  func.func @transform_3(%arg0: i32, %arg1: i32) -> (i32, i32) {
    %c0_i32 = arith.constant 0 : i32
    %c0_i32_0 = arith.constant 0 : i32
    %c0_i32_1 = arith.constant 0 : i32
    return %c0_i32, %c0_i32_0 : i32, i32
  }
  func.func @transform_4(%arg0: i32, %arg1: i32) -> (i32, i32) {
    %c0_i32 = arith.constant 0 : i32
    %c0_i32_0 = arith.constant 0 : i32
    %c0_i32_1 = arith.constant 0 : i32
    return %c0_i32, %c0_i32_0 : i32, i32
  }
  func.func @transform_5(%arg0: i32, %arg1: i32) -> (i32, i32) {
    %c0_i32 = arith.constant 0 : i32
    %c0_i32_0 = arith.constant 0 : i32
    %c0_i32_1 = arith.constant 0 : i32
    return %c0_i32, %c0_i32_0 : i32, i32
  }
  func.func @transform_6(%arg0: i32, %arg1: i32) -> (i32, i32) {
    %c0_i32 = arith.constant 0 : i32
    %c0_i32_0 = arith.constant 0 : i32
    %c0_i32_1 = arith.constant 0 : i32
    return %c0_i32, %c0_i32_0 : i32, i32
  }
  func.func @transform_7(%arg0: i32, %arg1: i32) -> (i32, i32) {
    %c0_i32 = arith.constant 0 : i32
    %c0_i32_0 = arith.constant 0 : i32
    %c0_i32_1 = arith.constant 0 : i32
    return %c0_i32, %c0_i32_0 : i32, i32
  }
  func.func @transform_8(%arg0: i32, %arg1: i32) -> (i32, i32) {
    %c0_i32 = arith.constant 0 : i32
    %c0_i32_0 = arith.constant 0 : i32
    %c0_i32_1 = arith.constant 0 : i32
    return %c0_i32, %c0_i32_0 : i32, i32
  }
  func.func @transform_9(%arg0: i32, %arg1: i32) -> (i32, i32) {
    %c0_i32 = arith.constant 0 : i32
    %c0_i32_0 = arith.constant 0 : i32
    return %arg0, %c0_i32 : i32, i32
  }
}

</mosaic_0001>

<bundles_post_ra>
// kernel: discriminator_forward.1
= control target key start
LH: loop header
LB: loop body
LE: loop exit
PB: predicated region body
PF: predicated region fallthrough
CT: control target
= control target key end

     0   :  { %s3087_s0 = inlined_call_operand.hbm [shape: bf16[2,768], index: 0, kind: input, shape index: {}]   ;;  %s3088_s1 = inlined_call_operand.vmem [shape: f32[2,1], index: 1, kind: input, shape index: {}]   ;;  %s3089_s2 = inlined_call_operand.hbm [shape: bf16[768,512], index: 2, kind: input, shape index: {}]   ;;  %s3090_s3 = inlined_call_operand.vmem [shape: bf16[1,512], index: 3, kind: input, shape index: {}]   ;;  %s3091_s4 = inlined_call_operand.vmem [shape: f32[1,512], index: 4, kind: input, shape index: {}]   ;;  %s3092_s5 = inlined_call_operand.hbm [shape: bf16[512,256], index: 5, kind: input, shape index: {}]   ;;  %s3093_s6 = inlined_call_operand.vmem [shape: f32[1,256], index: 6, kind: input, shape index: {}]   ;;  %s3094_s7 = inlined_call_operand.vmem [shape: f32[1,256], index: 7, kind: input, shape index: {}]   ;;  %s3095_s8 = inlined_call_operand.<no memory space> [shape: f32[1,1], index: 8, kind: input, shape index: {}]   ;;  %s3096_s9 = inlined_call_operand.vmem [shape: f32[2,1], index: 9, kind: output, shape index: {}]  }
   0x1   :  { %v14_v0 = vstv %s3095_s8 }
   0x2   :  { %15 = vst [vmem:[#allocation3] sm:$0x1] %v14_v0 }
   0x3   :  { %16 = vsyncpa [#allocation5], 0 }
   0x4   :  { %17 = vsyncpa [#allocation7], 0  ;;  %s2942_s11 = smov [#allocation6]  }
   0x5   :  { %s35_s12 = sshll.u32 %s2942_s11, 4  ;;  %s36_s12 = int_to_ptr.vmem [resolvable:$true] %s35_s12 }
   0x6   :  { %s2886_s13 = scalar_lea.vmem %s36_s12, 24576  ;;  %p2891_p1 = scmp.lt.s32.totalorder %s36_s12, %s36_s12 }
   0x7   :  { %p2887_p0 = scmp.ne.s32.totalorder %s36_s12, %s2886_s13  ;;  %p2892_p2 = scmp.lt.s32.totalorder %s2886_s13, %s2886_s13 }
   0x9   :  { %p2893_p3 = por %p2892_p2, %p2891_p1 }
   0xb   :  { %p2894_p4 = pnand %p2893_p3, %p2887_p0 }
   0xd   :  { %2897 = shalt.err (!%p2894_p4)
}
   0xe   :  { %s2943_s14 = smov 256   ;;  %s2944_s15 = smov 16  }
   0xf   :  { %41 = dma.hbm_to_vmem [thread:$0]  %s3089_s2, 24576, %s36_s12, [#allocation7], %s2943_s14, %s2943_s14, %s2944_s15  }
  0x10   :  { %s2945_s8 = smov [#allocation4]   ;;  %s2946_s19 = smov [#allocation8]  }
  0x11   :  { %s24_s18 = sshll.u32 %s2945_s8, 4  ;;  %s51_s20 = sshll.u32 %s2946_s19, 4  ;;  %s25_s18 = int_to_ptr.vmem [resolvable:$true] %s24_s18  ;;  %s52_s20 = int_to_ptr.vmem [resolvable:$true] %s51_s20 }
  0x12   :  { %s2906_s21 = scalar_lea.vmem %s25_s18, 96  ;;  %p2911_p6 = scmp.lt.s32.totalorder %s25_s18, %s25_s18 }
  0x13   :  { %p2907_p5 = scmp.ne.s32.totalorder %s25_s18, %s2906_s21  ;;  %p2912_p7 = scmp.lt.s32.totalorder %s2906_s21, %s2906_s21 }
  0x15   :  { %p2913_p8 = por %p2912_p7, %p2911_p6 }
  0x17   :  { %p2914_p9 = pnand %p2913_p8, %p2907_p5 }
  0x19   :  { %2917 = shalt.err (!%p2914_p9)
}
  0x1a   :  { %27 = dma.hbm_to_vmem [thread:$0]  %s3087_s0, 96, %s25_s18, [#allocation5]  }
  0x1b   :  { %s2926_s24 = scalar_lea.vmem %s52_s20, 8192  ;;  %p2931_p11 = scmp.lt.s32.totalorder %s52_s20, %s52_s20 }
  0x1c   :  { %p2927_p10 = scmp.ne.s32.totalorder %s52_s20, %s2926_s24  ;;  %p2932_p12 = scmp.lt.s32.totalorder %s2926_s24, %s2926_s24 }
  0x1e   :  { %p2933_p13 = por %p2932_p12, %p2931_p11 }
  0x20   :  { %p2934_p0 = pnand %p2933_p13, %p2927_p10 }
  0x22   :  { %2937 = shalt.err (!%p2934_p0)
}
  0x23   :  { %s2947_s2 = smov 128   ;;  %s2948_s25 = smov 8  }
  0x24   :  { %57 = dma.hbm_to_vmem [thread:$0]  %s3092_s5, 8192, %s52_s20, [#allocation7], %s2947_s2, %s2947_s2, %s2948_s25  }
  0x25   :  { %2938 = dma.done.wait [#allocation5], 96  }
  0x26   :  { %2939 = vsyncadd [#allocation5], 4294967200 }
  0x27   :  { %2940 = dma.done.wait [#allocation7], 32768  }
  0x28   :  { %2941 = vsyncadd [#allocation7], 4294934528  ;;  %v2489_v1 = vld [vmem:[#allocation6 + $0xe4] ss:$16 sps:$4 sm:$0xff]   ;;  %v2493_v3 = vld [vmem:[#allocation6 + $0xe0] ss:$16 sps:$4 sm:$0xff]   ;;  %v277_v39 = vlaneseq }
  0x29   :  { %v2491_v2 = vld [vmem:[#allocation6 + $0x2e4] ss:$16 sps:$4 sm:$0xff]   ;;  %1286 = vmatprep.subr.bf16.mxu0 %v2489_v1  ;;  %v2494_v4 = vld [vmem:[#allocation6 + $0x2e0] ss:$16 sps:$4 sm:$0xff]   ;;  %v2949_v37 = vmov 1966171168  }
  0x2a   :  { %1327 = vmatprep.subr.bf16.mxu1 %v2491_v2  ;;  %v2495_v5 = vld [vmem:[#allocation6 + $0xc4] ss:$16 sps:$4 sm:$0xff]   ;;  %1287 = vmatpush1.bf16.msra.mxu0 %v2493_v3  ;;  %v2499_v7 = vld [vmem:[#allocation6 + $0xc0] ss:$16 sps:$4 sm:$0xff]   ;;  %v275_v38 = vunpack.c.l.s4 %v2949_v37  ;;  %v3014_v44 = vshrl.u32 %v277_v39, 7  ;;  %vm2193_vm0 = vcmask 1041408  }
  0x2b   :  { %1328 = vmatpush1.bf16.msra.mxu1 %v2494_v4  ;;  %v2497_v6 = vld [vmem:[#allocation6 + $0x2c4] ss:$16 sps:$4 sm:$0xff]   ;;  %1288 = vmatprep.subr.bf16.mxu0 %v2495_v5  ;;  %v2500_v8 = vld [vmem:[#allocation6 + $0x2c0] ss:$16 sps:$4 sm:$0xff]   ;;  %v79_v53 = vld [vmem:[#allocation4] sm:$0x3f] }
  0x2c   :  { %1329 = vmatprep.subr.bf16.mxu1 %v2497_v6  ;;  %v2501_v9 = vld [vmem:[#allocation6 + $0xa4] ss:$16 sps:$4 sm:$0xff]   ;;  %v2505_v11 = vld [vmem:[#allocation6 + $0xa0] ss:$16 sps:$4 sm:$0xff]   ;;  %v276_v43 = vunpack.c.0.s8 %v275_v38  ;;  %v273_v56 = vcombine.high %v79_v53, %v79_v53  ;;  %v2612_v38 = vld [vmem:[#allocation6 + $0x68] ss:$16 sps:$4 sm:$0xff]  }
  0x2d   :  { %v2503_v10 = vld [vmem:[#allocation6 + $0x2a4] ss:$16 sps:$4 sm:$0xff]   ;;  %v2506_v12 = vld [vmem:[#allocation6 + $0x2a0] ss:$16 sps:$4 sm:$0xff]   ;;  %vm2213_vm1 = vcmask 1024  }
  0x2e   :  { %1289 = vmatpush1.bf16.msra.mxu0 %v2499_v7  ;;  %v2507_v13 = vld [vmem:[#allocation6 + $0x84] ss:$16 sps:$4 sm:$0xff]   ;;  %v2511_v15 = vld [vmem:[#allocation6 + $0x80] ss:$16 sps:$4 sm:$0xff]   ;;  %v3017_v50 = vsub.s32 %v276_v43, %v3014_v44 }
  0x2f   :  { %1330 = vmatpush1.bf16.msra.mxu1 %v2500_v8  ;;  %1290 = vmatprep.subr.bf16.mxu0 %v2501_v9  ;;  %v2509_v14 = vld [vmem:[#allocation6 + $0x284] ss:$16 sps:$4 sm:$0xff]   ;;  %v2512_v16 = vld [vmem:[#allocation6 + $0x280] ss:$16 sps:$4 sm:$0xff]  }
  0x30   :  { %1331 = vmatprep.subr.bf16.mxu1 %v2503_v10  ;;  %v2513_v17 = vld [vmem:[#allocation6 + $0x64] ss:$16 sps:$4 sm:$0xff]   ;;  %v2517_v19 = vld [vmem:[#allocation6 + $0x60] ss:$16 sps:$4 sm:$0xff]   ;;  %v280_v55 = vrot.slane %v79_v53, %v3017_v50  ;;  %v287_v61 = vrot.slane %v273_v56, %v3017_v50  ;;  %v2638_v53 = vld [vmem:[#allocation6 + $0x1ec] ss:$16 sps:$4 sm:$0xff]  }
  0x31   :  { %v2515_v18 = vld [vmem:[#allocation6 + $0x264] ss:$16 sps:$4 sm:$0xff]   ;;  %v2518_v20 = vld [vmem:[#allocation6 + $0x260] ss:$16 sps:$4 sm:$0xff]  }
  0x32   :  { %1291 = vmatpush1.bf16.msra.mxu0 %v2505_v11  ;;  %v2519_v21 = vld [vmem:[#allocation6 + $0x44] ss:$16 sps:$4 sm:$0xff]   ;;  %v2523_v23 = vld [vmem:[#allocation6 + $0x40] ss:$16 sps:$4 sm:$0xff]   ;;  %v288_v60 = vcombine.high %v280_v55, %v280_v55  ;;  %v3023_v0 = vrot.slane %v287_v61, %v3017_v50 }
  0x33   :  { %1332 = vmatpush1.bf16.msra.mxu1 %v2506_v12  ;;  %1292 = vmatprep.subr.bf16.mxu0 %v2507_v13  ;;  %v2521_v22 = vld [vmem:[#allocation6 + $0x244] ss:$16 sps:$4 sm:$0xff]   ;;  %v2524_v24 = vld [vmem:[#allocation6 + $0x240] ss:$16 sps:$4 sm:$0xff]  }
  0x34   :  { %1333 = vmatprep.subr.bf16.mxu1 %v2509_v14  ;;  %v2525_v25 = vld [vmem:[#allocation6 + $0x24] ss:$16 sps:$4 sm:$0xff]   ;;  %v2529_v27 = vld [vmem:[#allocation6 + $0x20] ss:$16 sps:$4 sm:$0xff]   ;;  %v310_v63 = vrot.slane %v288_v60, %v3017_v50  ;;  %v3029_v14 = vrot.slane %v280_v55, %v3017_v50  ;;  %v2636_v55 = vld [vmem:[#allocation6 + $0x1e8] ss:$16 sps:$4 sm:$0xff]  }
  0x35   :  { %v2527_v26 = vld [vmem:[#allocation6 + $0x224] ss:$16 sps:$4 sm:$0xff]   ;;  %v2530_v28 = vld [vmem:[#allocation6 + $0x220] ss:$16 sps:$4 sm:$0xff]  }
  0x36   :  { %1293 = vmatpush1.bf16.msra.mxu0 %v2511_v15  ;;  %v2531_v29 = vld [vmem:[#allocation6 + $0x4] ss:$16 sps:$4 sm:$0xff]   ;;  %v2535_v31 = vld [vmem:[#allocation6] ss:$16 sps:$4 sm:$0xff]   ;;  %v3025_v4 = vcombine.high %v310_v63, %v310_v63  ;;  %1318 = vmatprep.mubr.bf16.mxu0 %v310_v63 }
  0x37   :  { %1334 = vmatpush1.bf16.msra.mxu1 %v2512_v16  ;;  %1294 = vmatprep.subr.bf16.mxu0 %v2513_v17  ;;  %v2533_v30 = vld [vmem:[#allocation6 + $0x204] ss:$16 sps:$4 sm:$0xff]   ;;  %v2536_v32 = vld [vmem:[#allocation6 + $0x200] ss:$16 sps:$4 sm:$0xff]   ;;  %v2590_v17 = vld [vmem:[#allocation6 + $0xec] ss:$16 sps:$4 sm:$0xff]  }
  0x38   :  { %1335 = vmatprep.subr.bf16.mxu1 %v2515_v18  ;;  %v2537_v33 = vld [vmem:[#allocation6 + $0x1e4] ss:$16 sps:$4 sm:$0xff]   ;;  %v2541_v35 = vld [vmem:[#allocation6 + $0x1e0] ss:$16 sps:$4 sm:$0xff]   ;;  %1359 = vmatprep.mubr.bf16.mxu1 %v3025_v4  ;;  %v289_v18 = vcombine.high %v287_v61, %v287_v61  ;;  %v2650_v61 = vld [vmem:[#allocation6 + $0x1ac] ss:$16 sps:$4 sm:$0xff]  }
  0x39   :  { %v2539_v34 = vld [vmem:[#allocation6 + $0x3e4] ss:$16 sps:$4 sm:$0xff]   ;;  %v2542_v36 = vld [vmem:[#allocation6 + $0x3e0] ss:$16 sps:$4 sm:$0xff]  }
  0x3a   :  { %1295 = vmatpush1.bf16.msra.mxu0 %v2517_v19  ;;  %v2543_v40 = vld [vmem:[#allocation6 + $0x1c4] ss:$16 sps:$4 sm:$0xff]   ;;  %v2547_v42 = vld [vmem:[#allocation6 + $0x1c0] ss:$16 sps:$4 sm:$0xff]   ;;  %v3033_v19 = vcombine.high %v3029_v14, %v3029_v14 }
  0x3b   :  { %1336 = vmatpush1.bf16.msra.mxu1 %v2518_v20  ;;  %1296 = vmatprep.subr.bf16.mxu0 %v2519_v21  ;;  %v2545_v41 = vld [vmem:[#allocation6 + $0x3c4] ss:$16 sps:$4 sm:$0xff]   ;;  %v2548_v45 = vld [vmem:[#allocation6 + $0x3c0] ss:$16 sps:$4 sm:$0xff]   ;;  %v2588_v21 = vld [vmem:[#allocation6 + $0xe8] ss:$16 sps:$4 sm:$0xff]  }
  0x3c   :  { %1337 = vmatprep.subr.bf16.mxu1 %v2521_v22  ;;  %v2549_v46 = vld [vmem:[#allocation6 + $0x1a4] ss:$16 sps:$4 sm:$0xff]   ;;  %v2553_v48 = vld [vmem:[#allocation6 + $0x1a0] ss:$16 sps:$4 sm:$0xff]  }
  0x3d   :  { %v2551_v47 = vld [vmem:[#allocation6 + $0x3a4] ss:$16 sps:$4 sm:$0xff]   ;;  %v2554_v49 = vld [vmem:[#allocation6 + $0x3a0] ss:$16 sps:$4 sm:$0xff]  }
  0x3e   :  { %1297 = vmatpush1.bf16.msra.mxu0 %v2523_v23  ;;  %v2555_v51 = vld [vmem:[#allocation6 + $0x184] ss:$16 sps:$4 sm:$0xff]   ;;  %v2559_v54 = vld [vmem:[#allocation6 + $0x180] ss:$16 sps:$4 sm:$0xff]   ;;  %v2596_v23 = vld [vmem:[#allocation6 + $0xcc] ss:$16 sps:$4 sm:$0xff]  }
  0x3f   :  { %1338 = vmatpush1.bf16.msra.mxu1 %v2524_v24  ;;  %1298 = vmatprep.subr.bf16.mxu0 %v2525_v25  ;;  %v2557_v52 = vld [vmem:[#allocation6 + $0x384] ss:$16 sps:$4 sm:$0xff]   ;;  %v2560_v57 = vld [vmem:[#allocation6 + $0x380] ss:$16 sps:$4 sm:$0xff]   ;;  %v3036_v24 = vrot.slane %v289_v18, %v3017_v50  ;;  %v2672_v18 = vld [vmem:[#allocation6 + $0x128] ss:$16 sps:$4 sm:$0xff]  }
  0x40   :  { %1339 = vmatprep.subr.bf16.mxu1 %v2527_v26  ;;  %v2561_v58 = vld [vmem:[#allocation6 + $0x164] ss:$16 sps:$4 sm:$0xff]   ;;  %v2565_v62 = vld [vmem:[#allocation6 + $0x160] ss:$16 sps:$4 sm:$0xff]   ;;  %v2594_v26 = vld [vmem:[#allocation6 + $0xc8] ss:$16 sps:$4 sm:$0xff]  }
  0x41   :  { %v2563_v59 = vld [vmem:[#allocation6 + $0x364] ss:$16 sps:$4 sm:$0xff]   ;;  %v2566_v1 = vld [vmem:[#allocation6 + $0x360] ss:$16 sps:$4 sm:$0xff]  }
  0x42   :  { %1299 = vmatpush1.bf16.msra.mxu0 %v2529_v27  ;;  %v2567_v2 = vld [vmem:[#allocation6 + $0x144] ss:$16 sps:$4 sm:$0xff]   ;;  %v2571_v5 = vld [vmem:[#allocation6 + $0x140] ss:$16 sps:$4 sm:$0xff]  }
  0x43   :  { %1340 = vmatpush1.bf16.msra.mxu1 %v2530_v28  ;;  %1300 = vmatprep.subr.bf16.mxu0 %v2531_v29  ;;  %v2569_v3 = vld [vmem:[#allocation6 + $0x344] ss:$16 sps:$4 sm:$0xff]   ;;  %v2572_v6 = vld [vmem:[#allocation6 + $0x340] ss:$16 sps:$4 sm:$0xff]   ;;  %v2602_v28 = vld [vmem:[#allocation6 + $0xac] ss:$16 sps:$4 sm:$0xff]  }
  0x44   :  { %1341 = vmatprep.subr.bf16.mxu1 %v2533_v30  ;;  %v2573_v7 = vld [vmem:[#allocation6 + $0x124] ss:$16 sps:$4 sm:$0xff]   ;;  %v2577_v9 = vld [vmem:[#allocation6 + $0x120] ss:$16 sps:$4 sm:$0xff]   ;;  %v2600_v30 = vld [vmem:[#allocation6 + $0xa8] ss:$16 sps:$4 sm:$0xff]  }
  0x45   :  { %v2575_v8 = vld [vmem:[#allocation6 + $0x324] ss:$16 sps:$4 sm:$0xff]   ;;  %v2578_v10 = vld [vmem:[#allocation6 + $0x320] ss:$16 sps:$4 sm:$0xff]  }
  0x46   :  { %1301 = vmatpush1.bf16.msra.mxu0 %v2535_v31  ;;  %v2579_v11 = vld [vmem:[#allocation6 + $0x104] ss:$16 sps:$4 sm:$0xff]   ;;  %v2583_v13 = vld [vmem:[#allocation6 + $0x100] ss:$16 sps:$4 sm:$0xff]  }
  0x47   :  { %1342 = vmatpush1.bf16.msra.mxu1 %v2536_v32  ;;  %1302 = vmatprep.subr.bf16.mxu0 %v2537_v33  ;;  %v2581_v12 = vld [vmem:[#allocation6 + $0x304] ss:$16 sps:$4 sm:$0xff]   ;;  %v2584_v15 = vld [vmem:[#allocation6 + $0x300] ss:$16 sps:$4 sm:$0xff]   ;;  %v2608_v32 = vld [vmem:[#allocation6 + $0x8c] ss:$16 sps:$4 sm:$0xff]  }
  0x48   :  { %1343 = vmatprep.subr.bf16.mxu1 %v2539_v34  ;;  %v2587_v16 = vld [vmem:[#allocation6 + $0x4e4] ss:$16 sps:$4 sm:$0xff]   ;;  %v2585_v20 = vld [vmem:[#allocation6 + $0x4e0] ss:$16 sps:$4 sm:$0xff]   ;;  %v2606_v34 = vld [vmem:[#allocation6 + $0x88] ss:$16 sps:$4 sm:$0xff]  }
  0x49   :  { %v2593_v22 = vld [vmem:[#allocation6 + $0x4c4] ss:$16 sps:$4 sm:$0xff]   ;;  %v2591_v25 = vld [vmem:[#allocation6 + $0x4c0] ss:$16 sps:$4 sm:$0xff]  }
  0x4a   :  { %1303 = vmatpush2.bf16.msra.mxu0 %v2541_v35  ;;  %v2599_v27 = vld [vmem:[#allocation6 + $0x4a4] ss:$16 sps:$4 sm:$0xff]   ;;  %v2597_v29 = vld [vmem:[#allocation6 + $0x4a0] ss:$16 sps:$4 sm:$0xff]  }
  0x4b   :  { %1344 = vmatpush2.bf16.msra.mxu1 %v2542_v36  ;;  %1304 = vmatprep.subr.bf16.mxu0 %v2543_v40  ;;  %v2605_v31 = vld [vmem:[#allocation6 + $0x484] ss:$16 sps:$4 sm:$0xff]   ;;  %v2603_v33 = vld [vmem:[#allocation6 + $0x480] ss:$16 sps:$4 sm:$0xff]   ;;  %v2614_v36 = vld [vmem:[#allocation6 + $0x6c] ss:$16 sps:$4 sm:$0xff]  }
  0x4c   :  { %1345 = vmatprep.subr.bf16.mxu1 %v2545_v41  ;;  %v2611_v35 = vld [vmem:[#allocation6 + $0x464] ss:$16 sps:$4 sm:$0xff]   ;;  %v2609_v37 = vld [vmem:[#allocation6 + $0x460] ss:$16 sps:$4 sm:$0xff]   ;;  %v2620_v40 = vld [vmem:[#allocation6 + $0x4c] ss:$16 sps:$4 sm:$0xff]  }
  0x4d   :  { %v2617_v39 = vld [vmem:[#allocation6 + $0x444] ss:$16 sps:$4 sm:$0xff]   ;;  %v2615_v41 = vld [vmem:[#allocation6 + $0x440] ss:$16 sps:$4 sm:$0xff]  }
  0x4e   :  { %1305 = vmatpush2.bf16.msra.mxu0 %v2547_v42  ;;  %v2618_v42 = vld [vmem:[#allocation6 + $0x48] ss:$16 sps:$4 sm:$0xff]   ;;  %v2623_v43 = vld [vmem:[#allocation6 + $0x424] ss:$16 sps:$4 sm:$0xff]   ;;  %v2627_v50 = vld [vmem:[#allocation6 + $0x400] ss:$16 sps:$4 sm:$0xff]  }
  0x4f   :  { %1346 = vmatpush2.bf16.msra.mxu1 %v2548_v45  ;;  %1306 = vmatprep.subr.bf16.mxu0 %v2549_v46  ;;  %v2626_v45 = vld [vmem:[#allocation6 + $0x2c] ss:$16 sps:$4 sm:$0xff]   ;;  %v2621_v46 = vld [vmem:[#allocation6 + $0x420] ss:$16 sps:$4 sm:$0xff]   ;;  %v2641_v56 = vld [vmem:[#allocation6 + $0x5c4] ss:$16 sps:$4 sm:$0xff]  }
  0x50   :  { %1347 = vmatprep.subr.bf16.mxu1 %v2551_v47  ;;  %v2624_v47 = vld [vmem:[#allocation6 + $0x28] ss:$16 sps:$4 sm:$0xff]   ;;  %v2647_v60 = vld [vmem:[#allocation6 + $0x5a4] ss:$16 sps:$4 sm:$0xff]  }
  0x52   :  { %1307 = vmatpush2.bf16.msra.mxu0 %v2553_v48  ;;  %v2629_v48 = vld [vmem:[#allocation6 + $0x404] ss:$16 sps:$4 sm:$0xff]  }
  0x53   :  { %1348 = vmatpush2.bf16.msra.mxu1 %v2554_v49  ;;  %1308 = vmatprep.subr.bf16.mxu0 %v2555_v51  ;;  %v2632_v49 = vld [vmem:[#allocation6 + $0xc] ss:$16 sps:$4 sm:$0xff]   ;;  %v2630_v51 = vld [vmem:[#allocation6 + $0x8] ss:$16 sps:$4 sm:$0xff]  }
  0x54   :  { %1349 = vmatprep.subr.bf16.mxu1 %v2557_v52  ;;  %v2635_v52 = vld [vmem:[#allocation6 + $0x5e4] ss:$16 sps:$4 sm:$0xff]  }
  0x56   :  { %1309 = vmatpush2.bf16.msra.mxu0 %v2559_v54  ;;  %v2633_v54 = vld [vmem:[#allocation6 + $0x5e0] ss:$16 sps:$4 sm:$0xff]  }
  0x57   :  { %1350 = vmatpush2.bf16.msra.mxu1 %v2560_v57  ;;  %1310 = vmatprep.subr.bf16.mxu0 %v2561_v58  ;;  %v2644_v57 = vld [vmem:[#allocation6 + $0x1cc] ss:$16 sps:$4 sm:$0xff]   ;;  %v2639_v58 = vld [vmem:[#allocation6 + $0x5c0] ss:$16 sps:$4 sm:$0xff]  }
  0x58   :  { %1351 = vmatprep.subr.bf16.mxu1 %v2563_v59  ;;  %v2642_v59 = vld [vmem:[#allocation6 + $0x1c8] ss:$16 sps:$4 sm:$0xff]  }
  0x5a   :  { %1311 = vmatpush2.bf16.msra.mxu0 %v2565_v62  ;;  %v2645_v62 = vld [vmem:[#allocation6 + $0x5a0] ss:$16 sps:$4 sm:$0xff]  }
  0x5b   :  { %1352 = vmatpush2.bf16.msra.mxu1 %v2566_v1  ;;  %1312 = vmatprep.subr.bf16.mxu0 %v2567_v2  ;;  %v2653_v1 = vld [vmem:[#allocation6 + $0x584] ss:$16 sps:$4 sm:$0xff]   ;;  %v2656_v2 = vld [vmem:[#allocation6 + $0x18c] ss:$16 sps:$4 sm:$0xff]  }
  0x5c   :  { %1353 = vmatprep.subr.bf16.mxu1 %v2569_v3  ;;  %v2651_v3 = vld [vmem:[#allocation6 + $0x580] ss:$16 sps:$4 sm:$0xff]  }
  0x5e   :  { %1313 = vmatpush2.bf16.msra.mxu0 %v2571_v5  ;;  %v2654_v5 = vld [vmem:[#allocation6 + $0x188] ss:$16 sps:$4 sm:$0xff]  }
  0x5f   :  { %1354 = vmatpush2.bf16.msra.mxu1 %v2572_v6  ;;  %1314 = vmatprep.subr.bf16.mxu0 %v2573_v7  ;;  %v2659_v6 = vld [vmem:[#allocation6 + $0x564] ss:$16 sps:$4 sm:$0xff]   ;;  %v2662_v7 = vld [vmem:[#allocation6 + $0x16c] ss:$16 sps:$4 sm:$0xff]  }
  0x60   :  { %1355 = vmatprep.subr.bf16.mxu1 %v2575_v8  ;;  %v2657_v8 = vld [vmem:[#allocation6 + $0x560] ss:$16 sps:$4 sm:$0xff]  }
  0x62   :  { %1315 = vmatpush2.bf16.msra.mxu0 %v2577_v9  ;;  %v2660_v9 = vld [vmem:[#allocation6 + $0x168] ss:$16 sps:$4 sm:$0xff]  }
  0x63   :  { %1356 = vmatpush2.bf16.msra.mxu1 %v2578_v10  ;;  %1316 = vmatprep.subr.bf16.mxu0 %v2579_v11  ;;  %v2665_v10 = vld [vmem:[#allocation6 + $0x544] ss:$16 sps:$4 sm:$0xff]   ;;  %v2668_v11 = vld [vmem:[#allocation6 + $0x14c] ss:$16 sps:$4 sm:$0xff]  }
  0x64   :  { %1357 = vmatprep.subr.bf16.mxu1 %v2581_v12  ;;  %v2663_v12 = vld [vmem:[#allocation6 + $0x540] ss:$16 sps:$4 sm:$0xff]  }
  0x66   :  { %1317 = vmatpush2.bf16.msra.mxu0 %v2583_v13  ;;  %v2666_v13 = vld [vmem:[#allocation6 + $0x148] ss:$16 sps:$4 sm:$0xff]  }
  0x67   :  { %1358 = vmatpush2.bf16.msra.mxu1 %v2584_v15  ;;  %1368 = vmatprep.subr.bf16.mxu0 %v2587_v16  ;;  %v2671_v15 = vld [vmem:[#allocation6 + $0x524] ss:$16 sps:$4 sm:$0xff]   ;;  %v2674_v16 = vld [vmem:[#allocation6 + $0x12c] ss:$16 sps:$4 sm:$0xff]  }
  0x68   :  { %1409 = vmatprep.subr.bf16.mxu1 %v2590_v17  ;;  %v2669_v17 = vld [vmem:[#allocation6 + $0x520] ss:$16 sps:$4 sm:$0xff]  }
  0x69   :  { %1319 = vmatmul.mubr.bf16.vlgmr.msra.gmra.mxu0 %v3029_v14 }
  0x6a   :  { %1360 = vmatmul.mubr.bf16.vlgmr.msra.gmra.mxu1 %v3033_v19  ;;  %1369 = vmatpush1.bf16.msra.mxu0 %v2585_v20  ;;  %v2677_v20 = vld [vmem:[#allocation6 + $0x504] ss:$16 sps:$4 sm:$0xff]  }
  0x6b   :  { %1410 = vmatpush1.bf16.msra.mxu1 %v2588_v21  ;;  %1370 = vmatprep.subr.bf16.mxu0 %v2593_v22  ;;  %v2680_v21 = vld [vmem:[#allocation6 + $0x10c] ss:$16 sps:$4 sm:$0xff]   ;;  %v2675_v22 = vld [vmem:[#allocation6 + $0x500] ss:$16 sps:$4 sm:$0xff]  }
  0x6c   :  { %1411 = vmatprep.subr.bf16.mxu1 %v2596_v23  ;;  %1400 = vmatprep.mubr.bf16.mxu0 %v3036_v24  ;;  %v2678_v23 = vld [vmem:[#allocation6 + $0x108] ss:$16 sps:$4 sm:$0xff]  }
  0x6d   :  { %1441 = vmatprep.mubr.bf16.mxu1 %v310_v63  ;;  %v2648_v63 = vld [vmem:[#allocation6 + $0x1a8] ss:$16 sps:$4 sm:$0xff]  }
  0x6e   :  { %1371 = vmatpush1.bf16.msra.mxu0 %v2591_v25  ;;  %v2684_v25 = vld [vmem:[#allocation6 + $0x2ec] ss:$16 sps:$4 sm:$0xff]  }
  0x6f   :  { %1412 = vmatpush1.bf16.msra.mxu1 %v2594_v26  ;;  %1372 = vmatprep.subr.bf16.mxu0 %v2599_v27  ;;  %v2687_v26 = vld [vmem:[#allocation6 + $0x4ec] ss:$16 sps:$4 sm:$0xff]   ;;  %v2682_v27 = vld [vmem:[#allocation6 + $0x2e8] ss:$16 sps:$4 sm:$0xff]  }
  0x70   :  { %1413 = vmatprep.subr.bf16.mxu1 %v2602_v28  ;;  %v2685_v28 = vld [vmem:[#allocation6 + $0x4e8] ss:$16 sps:$4 sm:$0xff]  }
  0x72   :  { %1373 = vmatpush1.bf16.msra.mxu0 %v2597_v29  ;;  %v2690_v29 = vld [vmem:[#allocation6 + $0x2cc] ss:$16 sps:$4 sm:$0xff]  }
  0x73   :  { %1414 = vmatpush1.bf16.msra.mxu1 %v2600_v30  ;;  %1374 = vmatprep.subr.bf16.mxu0 %v2605_v31  ;;  %v2693_v30 = vld [vmem:[#allocation6 + $0x4cc] ss:$16 sps:$4 sm:$0xff]   ;;  %v2688_v31 = vld [vmem:[#allocation6 + $0x2c8] ss:$16 sps:$4 sm:$0xff]  }
  0x74   :  { %1415 = vmatprep.subr.bf16.mxu1 %v2608_v32  ;;  %v2691_v32 = vld [vmem:[#allocation6 + $0x4c8] ss:$16 sps:$4 sm:$0xff]  }
  0x76   :  { %1375 = vmatpush1.bf16.msra.mxu0 %v2603_v33  ;;  %v2696_v33 = vld [vmem:[#allocation6 + $0x2ac] ss:$16 sps:$4 sm:$0xff]  }
  0x77   :  { %1416 = vmatpush1.bf16.msra.mxu1 %v2606_v34  ;;  %1376 = vmatprep.subr.bf16.mxu0 %v2611_v35  ;;  %v2699_v34 = vld [vmem:[#allocation6 + $0x4ac] ss:$16 sps:$4 sm:$0xff]   ;;  %v2694_v35 = vld [vmem:[#allocation6 + $0x2a8] ss:$16 sps:$4 sm:$0xff]  }
  0x78   :  { %1417 = vmatprep.subr.bf16.mxu1 %v2614_v36  ;;  %v2697_v36 = vld [vmem:[#allocation6 + $0x4a8] ss:$16 sps:$4 sm:$0xff]  }
  0x7a   :  { %1377 = vmatpush1.bf16.msra.mxu0 %v2609_v37  ;;  %v2702_v37 = vld [vmem:[#allocation6 + $0x28c] ss:$16 sps:$4 sm:$0xff]  }
  0x7b   :  { %1418 = vmatpush1.bf16.msra.mxu1 %v2612_v38  ;;  %1378 = vmatprep.subr.bf16.mxu0 %v2617_v39  ;;  %v2705_v38 = vld [vmem:[#allocation6 + $0x48c] ss:$16 sps:$4 sm:$0xff]   ;;  %v2700_v39 = vld [vmem:[#allocation6 + $0x288] ss:$16 sps:$4 sm:$0xff]  }
  0x7c   :  { %1419 = vmatprep.subr.bf16.mxu1 %v2620_v40  ;;  %v2703_v40 = vld [vmem:[#allocation6 + $0x488] ss:$16 sps:$4 sm:$0xff]  }
  0x7e   :  { %1379 = vmatpush1.bf16.msra.mxu0 %v2615_v41  ;;  %v2950_v41 = vmov 0  }
  0x7f   :  { %1420 = vmatpush1.bf16.msra.mxu1 %v2618_v42  ;;  %1380 = vmatprep.subr.bf16.mxu0 %v2623_v43  ;;  %v2708_v42 = vld [vmem:[#allocation6 + $0x26c] ss:$16 sps:$4 sm:$0xff]  }
  0x80   :  { %1421 = vmatprep.subr.bf16.mxu1 %v2626_v45  ;;  %2488 = vset.pattern.permute.xlu0 %v2950_v41  ;;  %v2711_v43 = vld [vmem:[#allocation6 + $0x46c] ss:$16 sps:$4 sm:$0xff]   ;;  %v2796_v41 = vld [vmem:[#allocation8 + $0x40] ss:$8 sps:$4 sm:$0xff]  }
  0x81   :  { %v2714_v45 = vld [vmem:[#allocation6 + $0x24c] ss:$16 sps:$4 sm:$0xff]  }
  0x82   :  { %1381 = vmatpush1.bf16.msra.mxu0 %v2621_v46  ;;  %v2717_v46 = vld [vmem:[#allocation6 + $0x44c] ss:$16 sps:$4 sm:$0xff]  }
  0x83   :  { %1422 = vmatpush1.bf16.msra.mxu1 %v2624_v47  ;;  %1382 = vmatprep.subr.bf16.mxu0 %v2629_v48  ;;  %v2712_v47 = vld [vmem:[#allocation6 + $0x248] ss:$16 sps:$4 sm:$0xff]  }
  0x84   :  { %1423 = vmatprep.subr.bf16.mxu1 %v2632_v49  ;;  %v2715_v48 = vld [vmem:[#allocation6 + $0x448] ss:$16 sps:$4 sm:$0xff]   ;;  %v2720_v49 = vld [vmem:[#allocation6 + $0x22c] ss:$16 sps:$4 sm:$0xff]  }
  0x86   :  { %1383 = vmatpush1.bf16.msra.mxu0 %v2627_v50  ;;  %v2723_v50 = vld [vmem:[#allocation6 + $0x42c] ss:$16 sps:$4 sm:$0xff]  }
  0x87   :  { %1424 = vmatpush1.bf16.msra.mxu1 %v2630_v51  ;;  %1384 = vmatprep.subr.bf16.mxu0 %v2635_v52  ;;  %v2718_v51 = vld [vmem:[#allocation6 + $0x228] ss:$16 sps:$4 sm:$0xff]  }
  0x88   :  { %1425 = vmatprep.subr.bf16.mxu1 %v2638_v53  ;;  %v2721_v52 = vld [vmem:[#allocation6 + $0x428] ss:$16 sps:$4 sm:$0xff]   ;;  %v2726_v53 = vld [vmem:[#allocation6 + $0x20c] ss:$16 sps:$4 sm:$0xff]  }
  0x8a   :  { %1385 = vmatpush2.bf16.msra.mxu0 %v2633_v54  ;;  %v2729_v54 = vld [vmem:[#allocation6 + $0x40c] ss:$16 sps:$4 sm:$0xff]  }
  0x8b   :  { %1426 = vmatpush2.bf16.msra.mxu1 %v2636_v55  ;;  %1386 = vmatprep.subr.bf16.mxu0 %v2641_v56  ;;  %v2724_v55 = vld [vmem:[#allocation6 + $0x208] ss:$16 sps:$4 sm:$0xff]  }
  0x8c   :  { %1427 = vmatprep.subr.bf16.mxu1 %v2644_v57  ;;  %v2727_v56 = vld [vmem:[#allocation6 + $0x408] ss:$16 sps:$4 sm:$0xff]   ;;  %v2732_v57 = vld [vmem:[#allocation6 + $0x3ec] ss:$16 sps:$4 sm:$0xff]  }
  0x8e   :  { %1387 = vmatpush2.bf16.msra.mxu0 %v2639_v58  ;;  %v2735_v58 = vld [vmem:[#allocation6 + $0x5ec] ss:$16 sps:$4 sm:$0xff]  }
  0x8f   :  { %1428 = vmatpush2.bf16.msra.mxu1 %v2642_v59  ;;  %1388 = vmatprep.subr.bf16.mxu0 %v2647_v60  ;;  %v2730_v59 = vld [vmem:[#allocation6 + $0x3e8] ss:$16 sps:$4 sm:$0xff]  }
  0x90   :  { %1429 = vmatprep.subr.bf16.mxu1 %v2650_v61  ;;  %v2733_v60 = vld [vmem:[#allocation6 + $0x5e8] ss:$16 sps:$4 sm:$0xff]   ;;  %v2738_v61 = vld [vmem:[#allocation6 + $0x3cc] ss:$16 sps:$4 sm:$0xff]  }
  0x92   :  { %1389 = vmatpush2.bf16.msra.mxu0 %v2645_v62  ;;  %v2741_v62 = vld [vmem:[#allocation6 + $0x5cc] ss:$16 sps:$4 sm:$0xff]  }
  0x93   :  { %1430 = vmatpush2.bf16.msra.mxu1 %v2648_v63  ;;  %1390 = vmatprep.subr.bf16.mxu0 %v2653_v1  ;;  %v2736_v63 = vld [vmem:[#allocation6 + $0x3c8] ss:$16 sps:$4 sm:$0xff]  }
  0x94   :  { %1431 = vmatprep.subr.bf16.mxu1 %v2656_v2  ;;  %v2739_v1 = vld [vmem:[#allocation6 + $0x5c8] ss:$16 sps:$4 sm:$0xff]   ;;  %v2744_v2 = vld [vmem:[#allocation6 + $0x3ac] ss:$16 sps:$4 sm:$0xff]  }
  0x96   :  { %1391 = vmatpush2.bf16.msra.mxu0 %v2651_v3  ;;  %v2747_v3 = vld [vmem:[#allocation6 + $0x5ac] ss:$16 sps:$4 sm:$0xff]  }
  0x97   :  { %1432 = vmatpush2.bf16.msra.mxu1 %v2654_v5  ;;  %1392 = vmatprep.subr.bf16.mxu0 %v2659_v6  ;;  %v2742_v5 = vld [vmem:[#allocation6 + $0x3a8] ss:$16 sps:$4 sm:$0xff]  }
  0x98   :  { %1433 = vmatprep.subr.bf16.mxu1 %v2662_v7  ;;  %v2745_v6 = vld [vmem:[#allocation6 + $0x5a8] ss:$16 sps:$4 sm:$0xff]   ;;  %v2750_v7 = vld [vmem:[#allocation6 + $0x38c] ss:$16 sps:$4 sm:$0xff]  }
  0x9a   :  { %1393 = vmatpush2.bf16.msra.mxu0 %v2657_v8  ;;  %v2753_v8 = vld [vmem:[#allocation6 + $0x58c] ss:$16 sps:$4 sm:$0xff]  }
  0x9b   :  { %1434 = vmatpush2.bf16.msra.mxu1 %v2660_v9  ;;  %1394 = vmatprep.subr.bf16.mxu0 %v2665_v10  ;;  %v2748_v9 = vld [vmem:[#allocation6 + $0x388] ss:$16 sps:$4 sm:$0xff]  }
  0x9c   :  { %1435 = vmatprep.subr.bf16.mxu1 %v2668_v11  ;;  %v2751_v10 = vld [vmem:[#allocation6 + $0x588] ss:$16 sps:$4 sm:$0xff]   ;;  %v2756_v11 = vld [vmem:[#allocation6 + $0x36c] ss:$16 sps:$4 sm:$0xff]  }
  0x9e   :  { %1395 = vmatpush2.bf16.msra.mxu0 %v2663_v12  ;;  %v2759_v12 = vld [vmem:[#allocation6 + $0x56c] ss:$16 sps:$4 sm:$0xff]  }
  0x9f   :  { %1436 = vmatpush2.bf16.msra.mxu1 %v2666_v13  ;;  %1396 = vmatprep.subr.bf16.mxu0 %v2671_v15  ;;  %v2754_v13 = vld [vmem:[#allocation6 + $0x368] ss:$16 sps:$4 sm:$0xff]  }
  0xa0   :  { %1437 = vmatprep.subr.bf16.mxu1 %v2674_v16  ;;  %v2757_v15 = vld [vmem:[#allocation6 + $0x568] ss:$16 sps:$4 sm:$0xff]   ;;  %v2762_v16 = vld [vmem:[#allocation6 + $0x34c] ss:$16 sps:$4 sm:$0xff]  }
  0xa2   :  { %1397 = vmatpush2.bf16.msra.mxu0 %v2669_v17  ;;  %v2765_v17 = vld [vmem:[#allocation6 + $0x54c] ss:$16 sps:$4 sm:$0xff]  }
  0xa3   :  { %1438 = vmatpush2.bf16.msra.mxu1 %v2672_v18  ;;  %1398 = vmatprep.subr.bf16.mxu0 %v2677_v20  ;;  %v2760_v18 = vld [vmem:[#allocation6 + $0x348] ss:$16 sps:$4 sm:$0xff]  }
  0xa4   :  { %1439 = vmatprep.subr.bf16.mxu1 %v2680_v21  ;;  %v2763_v20 = vld [vmem:[#allocation6 + $0x548] ss:$16 sps:$4 sm:$0xff]   ;;  %v2768_v21 = vld [vmem:[#allocation6 + $0x32c] ss:$16 sps:$4 sm:$0xff]  }
  0xa6   :  { %1399 = vmatpush2.bf16.msra.mxu0 %v2675_v22  ;;  %v2771_v22 = vld [vmem:[#allocation6 + $0x52c] ss:$16 sps:$4 sm:$0xff]  }
  0xa7   :  { %1440 = vmatpush2.bf16.msra.mxu1 %v2678_v23  ;;  %1450 = vmatprep.subr.bf16.mxu0 %v2684_v25  ;;  %v2766_v23 = vld [vmem:[#allocation6 + $0x328] ss:$16 sps:$4 sm:$0xff]  }
  0xa8   :  { %1491 = vmatprep.subr.bf16.mxu1 %v2687_v26  ;;  %v2769_v25 = vld [vmem:[#allocation6 + $0x528] ss:$16 sps:$4 sm:$0xff]   ;;  %v2774_v26 = vld [vmem:[#allocation6 + $0x30c] ss:$16 sps:$4 sm:$0xff]  }
  0xa9   :  { %1401 = vmatmul.mubr.bf16.vlgmr.msra.gmra.mxu0 %v3023_v0 }
  0xaa   :  { %1442 = vmatmul.mubr.bf16.vlgmr.msra.gmra.mxu1 %v3029_v14  ;;  %1451 = vmatpush1.bf16.msra.mxu0 %v2682_v27  ;;  %v1559_v14 = vld [vmem:[%s3088_s1] sm:$0x3]  ;;  %v2777_v27 = vld [vmem:[#allocation6 + $0x50c] ss:$16 sps:$4 sm:$0xff]  }
  0xab   :  { %1492 = vmatpush1.bf16.msra.mxu1 %v2685_v28  ;;  %1452 = vmatprep.subr.bf16.mxu0 %v2690_v29  ;;  %v2772_v28 = vld [vmem:[#allocation6 + $0x308] ss:$16 sps:$4 sm:$0xff]  }
  0xac   :  { %1493 = vmatprep.subr.bf16.mxu1 %v2693_v30  ;;  %1482 = vmatprep.mubr.bf16.mxu0 %v3025_v4  ;;  %v2706_v4 = vld [vmem:[#allocation6 + $0x268] ss:$16 sps:$4 sm:$0xff]  }
  0xad   :  { %1523 = vmatprep.mubr.bf16.mxu1 %v3036_v24  ;;  %1565 = vperm.xlu0 %2488, %v1559_v14   ;;  %v2709_v24 = vld [vmem:[#allocation6 + $0x468] ss:$16 sps:$4 sm:$0xff]   ;;  %v2795_v14 = vld [vmem:[#allocation8 + $0x154] ss:$8 sps:$4 sm:$0xff]  }
  0xae   :  { %1453 = vmatpush1.bf16.msra.mxu0 %v2688_v31  ;;  %v2775_v29 = vld [vmem:[#allocation6 + $0x508] ss:$16 sps:$4 sm:$0xff]   ;;  %v2780_v31 = vld [vmem:[#allocation8 + $0x74] ss:$8 sps:$4 sm:$0xff]  }
  0xaf   :  { %1494 = vmatpush1.bf16.msra.mxu1 %v2691_v32  ;;  %1454 = vmatprep.subr.bf16.mxu0 %v2696_v33  ;;  %v2778_v30 = vld [vmem:[#allocation8 + $0x70] ss:$8 sps:$4 sm:$0xff]   ;;  %v2783_v33 = vld [vmem:[#allocation8 + $0x174] ss:$8 sps:$4 sm:$0xff]  }
  0xb0   :  { %1495 = vmatprep.subr.bf16.mxu1 %v2699_v34  ;;  %v2781_v32 = vld [vmem:[#allocation8 + $0x170] ss:$8 sps:$4 sm:$0xff]   ;;  %v2786_v34 = vld [vmem:[#allocation8 + $0x64] ss:$8 sps:$4 sm:$0xff]  }
  0xb2   :  { %1455 = vmatpush1.bf16.msra.mxu0 %v2694_v35  ;;  %v2789_v35 = vld [vmem:[#allocation8 + $0x164] ss:$8 sps:$4 sm:$0xff]  }
  0xb3   :  { %1496 = vmatpush1.bf16.msra.mxu1 %v2697_v36  ;;  %1456 = vmatprep.subr.bf16.mxu0 %v2702_v37  ;;  %v2784_v36 = vld [vmem:[#allocation8 + $0x60] ss:$8 sps:$4 sm:$0xff]  }
  0xb4   :  { %1497 = vmatprep.subr.bf16.mxu1 %v2705_v38  ;;  %v2787_v37 = vld [vmem:[#allocation8 + $0x160] ss:$8 sps:$4 sm:$0xff]   ;;  %v2792_v38 = vld [vmem:[#allocation8 + $0x54] ss:$8 sps:$4 sm:$0xff]  }
  0xb6   :  { %1457 = vmatpush1.bf16.msra.mxu0 %v2700_v39  ;;  %v2798_v39 = vld [vmem:[#allocation8 + $0x44] ss:$8 sps:$4 sm:$0xff]  }
  0xb7   :  { %1498 = vmatpush1.bf16.msra.mxu1 %v2703_v40  ;;  %1458 = vmatprep.subr.bf16.mxu0 %v2708_v42  ;;  %v2801_v40 = vld [vmem:[#allocation8 + $0x144] ss:$8 sps:$4 sm:$0xff]   ;;  %v2799_v42 = vld [vmem:[#allocation8 + $0x140] ss:$8 sps:$4 sm:$0xff]  }
  0xb8   :  { %1499 = vmatprep.subr.bf16.mxu1 %v2711_v43  ;;  %v2804_v43 = vld [vmem:[#allocation8 + $0x34] ss:$8 sps:$4 sm:$0xff]  }
  0xba   :  { %1459 = vmatpush1.bf16.msra.mxu0 %v2706_v4  ;;  %v2807_v4 = vld [vmem:[#allocation8 + $0x134] ss:$8 sps:$4 sm:$0xff]  }
  0xbb   :  { %1500 = vmatpush1.bf16.msra.mxu1 %v2709_v24  ;;  %1460 = vmatprep.subr.bf16.mxu0 %v2714_v45  ;;  %v2802_v24 = vld [vmem:[#allocation8 + $0x30] ss:$8 sps:$4 sm:$0xff]  }
  0xbc   :  { %1501 = vmatprep.subr.bf16.mxu1 %v2717_v46  ;;  %v2805_v45 = vld [vmem:[#allocation8 + $0x130] ss:$8 sps:$4 sm:$0xff]   ;;  %v2810_v46 = vld [vmem:[#allocation8 + $0x24] ss:$8 sps:$4 sm:$0xff]  }
  0xbe   :  { %1461 = vmatpush1.bf16.msra.mxu0 %v2712_v47  ;;  %v2813_v47 = vld [vmem:[#allocation8 + $0x124] ss:$8 sps:$4 sm:$0xff]  }
  0xbf   :  { %1502 = vmatpush1.bf16.msra.mxu1 %v2715_v48  ;;  %1462 = vmatprep.subr.bf16.mxu0 %v2720_v49  ;;  %v2808_v48 = vld [vmem:[#allocation8 + $0x20] ss:$8 sps:$4 sm:$0xff]  }
  0xc0   :  { %1503 = vmatprep.subr.bf16.mxu1 %v2723_v50  ;;  %v2811_v49 = vld [vmem:[#allocation8 + $0x120] ss:$8 sps:$4 sm:$0xff]   ;;  %v2816_v50 = vld [vmem:[#allocation8 + $0x14] ss:$8 sps:$4 sm:$0xff]  }
  0xc2   :  { %1463 = vmatpush1.bf16.msra.mxu0 %v2718_v51  ;;  %v2819_v51 = vld [vmem:[#allocation8 + $0x114] ss:$8 sps:$4 sm:$0xff]  }
  0xc3   :  { %1504 = vmatpush1.bf16.msra.mxu1 %v2721_v52  ;;  %1464 = vmatprep.subr.bf16.mxu0 %v2726_v53  ;;  %v2814_v52 = vld [vmem:[#allocation8 + $0x10] ss:$8 sps:$4 sm:$0xff]  }
  0xc4   :  { %1505 = vmatprep.subr.bf16.mxu1 %v2729_v54  ;;  %v2817_v53 = vld [vmem:[#allocation8 + $0x110] ss:$8 sps:$4 sm:$0xff]   ;;  %v2822_v54 = vld [vmem:[#allocation8 + $0x4] ss:$8 sps:$4 sm:$0xff]  }
  0xc6   :  { %1465 = vmatpush1.bf16.msra.mxu0 %v2724_v55  ;;  %v2825_v55 = vld [vmem:[#allocation8 + $0x104] ss:$8 sps:$4 sm:$0xff]  }
  0xc7   :  { %1506 = vmatpush1.bf16.msra.mxu1 %v2727_v56  ;;  %1466 = vmatprep.subr.bf16.mxu0 %v2732_v57  ;;  %v2820_v56 = vld [vmem:[#allocation8] ss:$8 sps:$4 sm:$0xff]  }
  0xc8   :  { %1507 = vmatprep.subr.bf16.mxu1 %v2735_v58  ;;  %v2823_v57 = vld [vmem:[#allocation8 + $0x100] ss:$8 sps:$4 sm:$0xff]   ;;  %v2828_v58 = vld [vmem:[#allocation8 + $0xf4] ss:$8 sps:$4 sm:$0xff]  }
  0xca   :  { %1467 = vmatpush2.bf16.msra.mxu0 %v2730_v59  ;;  %v2831_v59 = vld [vmem:[#allocation8 + $0x1f4] ss:$8 sps:$4 sm:$0xff]  }
  0xcb   :  { %1508 = vmatpush2.bf16.msra.mxu1 %v2733_v60  ;;  %1468 = vmatprep.subr.bf16.mxu0 %v2738_v61  ;;  %v2826_v60 = vld [vmem:[#allocation8 + $0xf0] ss:$8 sps:$4 sm:$0xff]  }
  0xcc   :  { %1509 = vmatprep.subr.bf16.mxu1 %v2741_v62  ;;  %v2829_v61 = vld [vmem:[#allocation8 + $0x1f0] ss:$8 sps:$4 sm:$0xff]   ;;  %v2834_v62 = vld [vmem:[#allocation8 + $0xe4] ss:$8 sps:$4 sm:$0xff]  }
  0xce   :  { %1469 = vmatpush2.bf16.msra.mxu0 %v2736_v63  ;;  %v2832_v63 = vld [vmem:[#allocation8 + $0xe0] ss:$8 sps:$4 sm:$0xff]  }
  0xcf   :  { %1510 = vmatpush2.bf16.msra.mxu1 %v2739_v1  ;;  %1470 = vmatprep.subr.bf16.mxu0 %v2744_v2 }
  0xd0   :  { %1511 = vmatprep.subr.bf16.mxu1 %v2747_v3  ;;  %v2837_v3 = vld [vmem:[#allocation8 + $0x1e4] ss:$8 sps:$4 sm:$0xff]  }
  0xd2   :  { %1471 = vmatpush2.bf16.msra.mxu0 %v2742_v5 }
  0xd3   :  { %1512 = vmatpush2.bf16.msra.mxu1 %v2745_v6  ;;  %1472 = vmatprep.subr.bf16.mxu0 %v2750_v7  ;;  %v2835_v6 = vld [vmem:[#allocation8 + $0x1e0] ss:$8 sps:$4 sm:$0xff]  }
  0xd4   :  { %1513 = vmatprep.subr.bf16.mxu1 %v2753_v8 }
  0xd6   :  { %1473 = vmatpush2.bf16.msra.mxu0 %v2748_v9  ;;  %v2840_v9 = vld [vmem:[#allocation8 + $0xd4] ss:$8 sps:$4 sm:$0xff]  }
  0xd7   :  { %1514 = vmatpush2.bf16.msra.mxu1 %v2751_v10  ;;  %1474 = vmatprep.subr.bf16.mxu0 %v2756_v11  ;;  %v2838_v11 = vld [vmem:[#allocation8 + $0xd0] ss:$8 sps:$4 sm:$0xff]  }
  0xd8   :  { %1515 = vmatprep.subr.bf16.mxu1 %v2759_v12 }
  0xda   :  { %1475 = vmatpush2.bf16.msra.mxu0 %v2754_v13 }
  0xdb   :  { %1516 = vmatpush2.bf16.msra.mxu1 %v2757_v15  ;;  %1476 = vmatprep.subr.bf16.mxu0 %v2762_v16  ;;  %v2843_v15 = vld [vmem:[#allocation8 + $0x1d4] ss:$8 sps:$4 sm:$0xff]   ;;  %v2841_v16 = vld [vmem:[#allocation8 + $0x1d0] ss:$8 sps:$4 sm:$0xff]  }
  0xdc   :  { %1517 = vmatprep.subr.bf16.mxu1 %v2765_v17 }
  0xde   :  { %1477 = vmatpush2.bf16.msra.mxu0 %v2760_v18 }
  0xdf   :  { %1518 = vmatpush2.bf16.msra.mxu1 %v2763_v20  ;;  %1478 = vmatprep.subr.bf16.mxu0 %v2768_v21  ;;  %v2846_v20 = vld [vmem:[#allocation8 + $0xc4] ss:$8 sps:$4 sm:$0xff]   ;;  %v2844_v21 = vld [vmem:[#allocation8 + $0xc0] ss:$8 sps:$4 sm:$0xff]  }
  0xe0   :  { %1519 = vmatprep.subr.bf16.mxu1 %v2771_v22  ;;  %v2849_v22 = vld [vmem:[#allocation8 + $0x1c4] ss:$8 sps:$4 sm:$0xff]  }
  0xe2   :  { %1479 = vmatpush2.bf16.msra.mxu0 %v2766_v23  ;;  %v2847_v23 = vld [vmem:[#allocation8 + $0x1c0] ss:$8 sps:$4 sm:$0xff]  }
  0xe3   :  { %1520 = vmatpush2.bf16.msra.mxu1 %v2769_v25  ;;  %1480 = vmatprep.subr.bf16.mxu0 %v2774_v26  ;;  %v2852_v25 = vld [vmem:[#allocation8 + $0xb4] ss:$8 sps:$4 sm:$0xff]   ;;  %v2850_v26 = vld [vmem:[#allocation8 + $0xb0] ss:$8 sps:$4 sm:$0xff]  }
  0xe4   :  { %1521 = vmatprep.subr.bf16.mxu1 %v2777_v27  ;;  %v2853_v27 = vld [vmem:[#allocation8 + $0x1b0] ss:$8 sps:$4 sm:$0xff]  }
  0xe6   :  { %1481 = vmatpush2.bf16.msra.mxu0 %v2772_v28  ;;  %v2855_v28 = vld [vmem:[#allocation8 + $0x1b4] ss:$8 sps:$4 sm:$0xff]  }
  0xe7   :  { %1522 = vmatpush2.bf16.msra.mxu1 %v2775_v29  ;;  %2093 = vmatprep.subr.bf16.mxu0 %v2780_v31  ;;  %v2858_v29 = vld [vmem:[#allocation8 + $0xa4] ss:$8 sps:$4 sm:$0xff]  }
  0xe8   :  { %2134 = vmatprep.subr.bf16.mxu1 %v2783_v33  ;;  %v2861_v31 = vld [vmem:[#allocation8 + $0x1a4] ss:$8 sps:$4 sm:$0xff]   ;;  %v2859_v33 = vld [vmem:[#allocation8 + $0x1a0] ss:$8 sps:$4 sm:$0xff]  }
  0xe9   :  { %1483 = vmatmul.mubr.bf16.vlgmr.msra.gmra.mxu0 %v3033_v19  ;;  %v2790_v19 = vld [vmem:[#allocation8 + $0x50] ss:$8 sps:$4 sm:$0xff]  }
  0xea   :  { %1524 = vmatmul.mubr.bf16.vlgmr.msra.gmra.mxu1 %v3023_v0  ;;  %2094 = vmatpush1.bf16.msra.mxu0 %v2778_v30  ;;  %v2793_v0 = vld [vmem:[#allocation8 + $0x150] ss:$8 sps:$4 sm:$0xff]   ;;  %v2856_v30 = vld [vmem:[#allocation8 + $0xa0] ss:$8 sps:$4 sm:$0xff]  }
  0xeb   :  { %2135 = vmatpush1.bf16.msra.mxu1 %v2781_v32  ;;  %2095 = vmatprep.subr.bf16.mxu0 %v2786_v34  ;;  %v2864_v32 = vld [vmem:[#allocation8 + $0x94] ss:$8 sps:$4 sm:$0xff]  }
  0xec   :  { %2136 = vmatprep.subr.bf16.mxu1 %v2789_v35  ;;  %v2867_v34 = vld [vmem:[#allocation8 + $0x194] ss:$8 sps:$4 sm:$0xff]   ;;  %v2862_v35 = vld [vmem:[#allocation8 + $0x90] ss:$8 sps:$4 sm:$0xff]  }
  0xee   :  { %2096 = vmatpush1.bf16.msra.mxu0 %v2784_v36  ;;  %v2870_v36 = vld [vmem:[#allocation8 + $0x84] ss:$8 sps:$4 sm:$0xff]  }
  0xef   :  { %2137 = vmatpush1.bf16.msra.mxu1 %v2787_v37  ;;  %2097 = vmatprep.subr.bf16.mxu0 %v2792_v38  ;;  %v2865_v37 = vld [vmem:[#allocation8 + $0x190] ss:$8 sps:$4 sm:$0xff]   ;;  %v2873_v38 = vld [vmem:[#allocation8 + $0x184] ss:$8 sps:$4 sm:$0xff]  }
  0xf0   :  { %2138 = vmatprep.subr.bf16.mxu1 %v2795_v14  ;;  %v2868_v14 = vld [vmem:[#allocation8 + $0x80] ss:$8 sps:$4 sm:$0xff]  }
  0xf2   :  { %2098 = vmatpush1.bf16.msra.mxu0 %v2790_v19  ;;  %v2871_v19 = vld [vmem:[#allocation8 + $0x180] ss:$8 sps:$4 sm:$0xff]  }
  0xf3   :  { %2139 = vmatpush1.bf16.msra.mxu1 %v2793_v0  ;;  %2099 = vmatprep.subr.bf16.mxu0 %v2798_v39 }
  0xf4   :  { %2140 = vmatprep.subr.bf16.mxu1 %v2801_v40 }
  0xf6   :  { %2100 = vmatpush1.bf16.msra.mxu0 %v2796_v41 }
  0xf7   :  { %2141 = vmatpush1.bf16.msra.mxu1 %v2799_v42  ;;  %2101 = vmatprep.subr.bf16.mxu0 %v2804_v43 }
  0xf8   :  { %2142 = vmatprep.subr.bf16.mxu1 %v2807_v4 }
  0xfa   :  { %2102 = vmatpush1.bf16.msra.mxu0 %v2802_v24 }
  0xfb   :  { %2143 = vmatpush1.bf16.msra.mxu1 %v2805_v45  ;;  %2103 = vmatprep.subr.bf16.mxu0 %v2810_v46 }
  0xfc   :  { %2144 = vmatprep.subr.bf16.mxu1 %v2813_v47 }
  0xfe   :  { %2104 = vmatpush1.bf16.msra.mxu0 %v2808_v48  ;;  %v1561_v48 = vld [vmem:[%s3090_s3] sm:$0xf] }
  0xff   :  { %2145 = vmatpush1.bf16.msra.mxu1 %v2811_v49  ;;  %2105 = vmatprep.subr.bf16.mxu0 %v2816_v50  ;;  %v1562_v49 = vunpack.c.l.bf16 %v1561_v48  ;;  %v3054_v50 = vsub.s32 0, %v3014_v44 }
 0x100   :  { %2146 = vmatprep.subr.bf16.mxu1 %v2819_v51  ;;  %v1575_v51 = vsub.s32 2, %v3014_v44 }
 0x102   :  { %2106 = vmatpush1.bf16.msra.mxu0 %v2814_v52  ;;  %v1579_v52 = vsub.s32 4, %v3014_v44 }
 0x103   :  { %2147 = vmatpush1.bf16.msra.mxu1 %v2817_v53  ;;  %2107 = vmatprep.subr.bf16.mxu0 %v2822_v54  ;;  %v1583_v53 = vsub.s32 6, %v3014_v44  ;;  %v1572_v54 = vrot.slane %v1562_v49, %v3054_v50 }
 0x104   :  { %2148 = vmatprep.subr.bf16.mxu1 %v2825_v55  ;;  %v1576_v55 = vrot.slane %v1562_v49, %v1575_v51 }
 0x106   :  { %2108 = vmatpush1.bf16.msra.mxu0 %v2820_v56  ;;  %v1580_v56 = vrot.slane %v1562_v49, %v1579_v52 }
 0x107   :  { %2149 = vmatpush1.bf16.msra.mxu1 %v2823_v57  ;;  %2109 = vmatprep.subr.bf16.mxu0 %v2828_v58  ;;  %v1584_v57 = vrot.slane %v1562_v49, %v1583_v53  ;;  %v1592_v58 = vrot.slane %v1572_v54, %v3054_v50 }
 0x108   :  { %2150 = vmatprep.subr.bf16.mxu1 %v2831_v59  ;;  %v1596_v59 = vrot.slane %v1576_v55, %v3054_v50 }
 0x10a   :  { %2110 = vmatpush2.bf16.msra.mxu0 %v2826_v60  ;;  %v1600_v60 = vrot.slane %v1580_v56, %v3054_v50 }
 0x10b   :  { %2151 = vmatpush2.bf16.msra.mxu1 %v2829_v61  ;;  %2111 = vmatprep.subr.bf16.mxu0 %v2834_v62  ;;  %v1604_v61 = vrot.slane %v1584_v57, %v3054_v50  ;;  %v2951_v62 = vmov 1983009808  }
 0x10c   :  { %2152 = vmatprep.subr.bf16.mxu1 %v2837_v3  ;;  %v3066_v3 = vsub.s32 1, %v3014_v44 }
 0x10e   :  { %2112 = vmatpush2.bf16.msra.mxu0 %v2832_v63  ;;  %v1539_v63 = vunpack.c.l.s4 %v2951_v62 }
 0x10f   :  { %2153 = vmatpush2.bf16.msra.mxu1 %v2835_v6  ;;  %2113 = vmatprep.subr.bf16.mxu0 %v2840_v9 }
 0x110   :  { %2154 = vmatprep.subr.bf16.mxu1 %v2843_v15 }
 0x112   :  { %2114 = vmatpush2.bf16.msra.mxu0 %v2838_v11 }
 0x113   :  { %2155 = vmatpush2.bf16.msra.mxu1 %v2841_v16  ;;  %2115 = vmatprep.subr.bf16.mxu0 %v2846_v20 }
 0x114   :  { %2156 = vmatprep.subr.bf16.mxu1 %v2849_v22 }
 0x116   :  { %2116 = vmatpush2.bf16.msra.mxu0 %v2844_v21 }
 0x117   :  { %2157 = vmatpush2.bf16.msra.mxu1 %v2847_v23  ;;  %2117 = vmatprep.subr.bf16.mxu0 %v2852_v25 }
 0x118   :  { %2158 = vmatprep.subr.bf16.mxu1 %v2855_v28 }
 0x11a   :  { %2118 = vmatpush2.bf16.msra.mxu0 %v2850_v26 }
 0x11b   :  { %2119 = vmatprep.subr.bf16.mxu0 %v2858_v29  ;;  %2159 = vmatpush2.bf16.msra.mxu1 %v2853_v27 }
 0x11c   :  { %2160 = vmatprep.subr.bf16.mxu1 %v2861_v31 }
 0x11e   :  { %2120 = vmatpush2.bf16.msra.mxu0 %v2856_v30 }
 0x11f   :  { %2121 = vmatprep.subr.bf16.mxu0 %v2864_v32  ;;  %2161 = vmatpush2.bf16.msra.mxu1 %v2859_v33 }
 0x120   :  { %2162 = vmatprep.subr.bf16.mxu1 %v2867_v34 }
 0x122   :  { %2122 = vmatpush2.bf16.msra.mxu0 %v2862_v35 }
 0x123   :  { %2123 = vmatprep.subr.bf16.mxu0 %v2870_v36  ;;  %2163 = vmatpush2.bf16.msra.mxu1 %v2865_v37 }
 0x124   :  { %2164 = vmatprep.subr.bf16.mxu1 %v2873_v38 }
 0x126   :  { %2124 = vmatpush2.bf16.msra.mxu0 %v2868_v14 }
 0x127   :  { %2165 = vmatpush2.bf16.msra.mxu1 %v2871_v19 }
 0x129   :  { %v1320_v1 = vpop.f32.mrf.mxu0 }
 0x12a   :  { %v1361_v2 = vpop.f32.mrf.mxu1 }
 0x12b   :  { %v1362_v5 = vadd.f32 %v1361_v2, %v1320_v1  ;;  %v1322_v7 = vpop.f32.mrf.mxu0  ;;  %v1566_v1 = vpop.permute.xlu0 %1565  ;;  %v1648_v2 = vsub.s32 3, %v3014_v44 }
 0x12c   :  { %v1363_v8 = vpop.f32.mrf.mxu1  ;;  %v1605_v6 = vmul.f32 %v1592_v58, %v1566_v1  ;;  %v1608_v9 = vmul.f32 %v1604_v61, %v1566_v1  ;;  %v2179_v61 = vld [vmem:[%s3094_s7] sm:$0x3] }
 0x12d   :  { %v1364_v10 = vadd.f32 %v1363_v8, %v1322_v7  ;;  %v1324_v12 = vpop.f32.mrf.mxu0  ;;  %v1606_v7 = vmul.f32 %v1596_v59, %v1566_v1  ;;  %v1607_v8 = vmul.f32 %v1600_v60, %v1566_v1 }
 0x12e   :  { %v1365_v13 = vpop.f32.mrf.mxu1 }
 0x12f   :  { %v1325_v17 = vpop.f32.mrf.mxu0  ;;  %v1613_v20 = vcombine.low %v1605_v6, %v1606_v7  ;;  %v1614_v21 = vcombine.low %v1607_v8, %v1608_v9  ;;  %v2184_v7 = vrot.slane %v2179_v61, %v3054_v50 }
 0x130   :  { %v1366_v18 = vpop.f32.mrf.mxu1 }
 0x169   :  { %v1402_v0 = vpop.f32.mrf.mxu0 }
 0x16a   :  { %v1443_v39 = vpop.f32.mrf.mxu1  ;;  %v1403_v40 = vadd.f32 %v1402_v0, %v1362_v5  ;;  %v1632_v5 = vld [vmem:[%s3091_s4] sm:$0xf] }
 0x16b   :  { %v1404_v41 = vpop.f32.mrf.mxu0  ;;  %v1645_v11 = vrot.slane %v1632_v5, %v1575_v51  ;;  %v1649_v12 = vrot.slane %v1632_v5, %v1648_v2  ;;  %v1637_v13 = vrot.slane %v1632_v5, %v3054_v50  ;;  %v1641_v15 = vrot.slane %v1632_v5, %v3066_v3 }
 0x16c   :  { %v1445_v42 = vpop.f32.mrf.mxu1  ;;  %v1405_v43 = vadd.f32 %v1404_v41, %v1364_v10  ;;  %v1540_v10 = vunpack.c.0.s8 %v1539_v63 }
 0x16d   :  { %v1406_v4 = vpop.f32.mrf.mxu0  ;;  %v1651_v27 = vcombine.low %v1645_v11, %v1649_v12  ;;  %v1650_v28 = vcombine.low %v1637_v13, %v1641_v15  ;;  %v2188_v12 = vrot.slane %v2179_v61, %v3066_v3 }
 0x16e   :  { %v1447_v24 = vpop.f32.mrf.mxu1  ;;  %v1536_v45 = vcombine.low %v1403_v40, %v1405_v43  ;;  %v1543_v25 = vsub.s32 %v1540_v10, %v3014_v44 }
 0x16f   :  { %v1407_v46 = vpop.f32.mrf.mxu0 }
 0x170   :  { %v1448_v47 = vpop.f32.mrf.mxu1  ;;  %v1621_v33 = vrot.slane %v1613_v20, %v1543_v25  ;;  %v1628_v34 = vrot.slane %v1614_v21, %v1543_v25  ;;  %v1658_v38 = vrot.slane %v1650_v28, %v1543_v25  ;;  %v1665_v14 = vrot.slane %v1651_v27, %v1543_v25 }
 0x171   :  { %v1544_v19 = vrot.slane %v1536_v45, %v1543_v25  ;;  %v1761_v45 = vld [vmem:[%s3093_s6] sm:$0x3] }
 0x172   :  { %v1666_v41 = vcombine.low %v1658_v38, %v1665_v14  ;;  %v1766_v55 = vrot.slane %v1761_v45, %v3054_v50  ;;  %v1770_v56 = vrot.slane %v1761_v45, %v3066_v3 }
 0x1a9   :  { %v1484_v16 = vpop.f32.mrf.mxu0 }
 0x1aa   :  { %v1525_v17 = vpop.f32.mrf.mxu1  ;;  %v1485_v18 = vadd.f32 %v1484_v16, %v1443_v39  ;;  %v1629_v39 = vcombine.low %v1621_v33, %v1628_v34 }
 0x1ab   :  { %v1486_v22 = vpop.f32.mrf.mxu0 }
 0x1ac   :  { %v1527_v23 = vpop.f32.mrf.mxu1  ;;  %v1487_v26 = vadd.f32 %v1486_v22, %v1445_v42  ;;  %v1526_v31 = vadd.f32 %v1525_v17, %v1485_v18  ;;  %v2477_v22 = vld [vmem:[#allocation3] ss:$0 sm:$0xff] }
 0x1ad   :  { %v1488_v29 = vpop.f32.mrf.mxu0 }
 0x1ae   :  { %v1529_v30 = vpop.f32.mrf.mxu1  ;;  %v1528_v32 = vadd.f32 %v1527_v23, %v1487_v26 }
 0x1af   :  { %v1489_v35 = vpop.f32.mrf.mxu0 }
 0x1b0   :  { %v1530_v36 = vpop.f32.mrf.mxu1  ;;  %v1537_v37 = vcombine.low %v1526_v31, %v1528_v32 }
 0x1b2   :  { %v1551_v0 = vrot.slane %v1537_v37, %v1543_v25 }
 0x1b4   :  { %v1552_v40 = vcombine.low %v1544_v19, %v1551_v0 }
 0x1b6   :  { %v1631_v44 = vadd.f32 %v1629_v39, %v1552_v40 }
 0x1b8   :  { %v1668_v42 = vadd.f32 %v1666_v41, %v1631_v44 }
 0x1ba   :  { %v1669_v43 = vmul.f32 0.2, %v1668_v42 }
 0x1bc   :  { %v1670_v4 = vmax.f32 %v1668_v42, %v1669_v43 }
 0x1be   :  { %v1679_v24 = vrot.slane %v1670_v4, %v1543_v25  ;;  %v1672_v46 = vcombine.high %v1670_v4, %v1670_v4 }
 0x1c0   :  { %v1687_v47 = vcombine.high %v1679_v24, %v1679_v24  ;;  %v1686_v48 = vrot.slane %v1672_v46, %v1543_v25  ;;  %v1693_v52 = vpack.c.bf16 %v1679_v24, %v1679_v24 }
 0x1c2   :  { %v1694_v49 = vpack.c.bf16 %v1687_v47, %v1687_v47  ;;  %v1688_v51 = vcombine.high %v1686_v48, %v1686_v48  ;;  %v1695_v54 = vpack.c.bf16 %v1686_v48, %v1686_v48 }
 0x1c4   :  { %2125 = vmatprep.mubr.bf16.mxu0 %v1694_v49  ;;  %v1696_v53 = vpack.c.bf16 %v1688_v51, %v1688_v51 }
 0x1c5   :  { %2126 = vmatmul.mubr.bf16.vlgmr.msra.gmra.mxu0 %v1693_v52 }
 0x1c6   :  { %2166 = vmatprep.mubr.bf16.mxu1 %v1696_v53 }
 0x1c7   :  { %2167 = vmatmul.mubr.bf16.vlgmr.msra.gmra.mxu1 %v1695_v54 }
 0x285   :  { %v2127_v57 = vpop.f32.mrf.mxu0 }
 0x286   :  { %v2128_v58 = vadd.f32 %v2127_v57, %v1766_v55 }
 0x287   :  { %v2129_v59 = vpop.f32.mrf.mxu0  ;;  %v2168_v60 = vpop.f32.mrf.mxu1 }
 0x288   :  { %v2130_v62 = vadd.f32 %v2129_v59, %v1770_v56  ;;  %v2169_v63 = vadd.f32 %v2168_v60, %v2128_v58 }
 0x289   :  { %v2131_v1 = vpop.f32.mrf.mxu0  ;;  %v2170_v2 = vpop.f32.mrf.mxu1 }
 0x28a   :  { %v2175_v5 = vmul.f32 0.2, %v2169_v63  ;;  %v2171_v6 = vadd.f32 %v2170_v2, %v2130_v62 }
 0x28b   :  { %v2132_v8 = vpop.f32.mrf.mxu0  ;;  %v2172_v9 = vpop.f32.mrf.mxu1 }
 0x28c   :  { %v2177_v10 = vmax.f32 %v2169_v63, %v2175_v5  ;;  %v2176_v11 = vmul.f32 0.2, %v2171_v6 }
 0x28d   :  { %v2173_v13 = vpop.f32.mrf.mxu1 }
 0x28e   :  { %v2178_v15 = vmax.f32 %v2171_v6, %v2176_v11  ;;  %v2191_v16 = vmul.f32 %v2184_v7, %v2177_v10 }
 0x290   :  { %v2192_v17 = vmul.f32 %v2188_v12, %v2178_v15  ;;  %v2194_v18 = vsel %vm2193_vm0, %v2191_v16, 0.0 }
 0x292   :  { %v2195_v20 = vsel %vm2193_vm0, %v2192_v17, 0.0 }
 0x293   :  { %v2196_v21 = vadd.f32 %v2195_v20, %v2194_v18 }
 0x295   :  { %2197 = vadd.xlane.f32.xlu0 %v2196_v21 }
 0x31e   :  { %v2198_v23 = vpop.xlane.xlu0 %2197 }
 0x31f   :  { %v2206_v25 = vadd.f32 %v2477_v22, %v2198_v23 }
 0x321   :  { %v2207_v26 = vsub.f32 0.0, %v2206_v25 }
 0x323   :  { %v2208_v50 = vmul.f32 1.442695, %v2207_v26 }
 0x325   :  { %2874 = vpow2.f32 %v2208_v50 }
 0x332   :  { %v2875_v27 = vpop.eup %2874 }
 0x333   :  { %v2210_v28 = vadd.f32 1.0, %v2875_v27 }
 0x335   :  { %2876 = vrcp.f32 %v2210_v28 }
 0x342   :  { %v2877_v3 = vpop.eup %2876 }
 0x343   :  { %2214 = vst.msk [vmem:[%s3096_s9] sm:$0x3] %vm2213_vm1, %v2877_v3 }
 0x344   :  { %2219 = vsyncpa [#allocation5], 1 }
 0x345   :  { %2220 = vsyncpa [#allocation7], 1 }

</bundles_post_ra>
